<compile_context>
chip_gen: v7x
topology: tpu7x:2x2x1
jax: 0.10.0
libtpu: 0.0.40
codegen_flags: <defaults>
</compile_context>

<pallas_src>
import functools

import jax
import jax.numpy as jnp
import numpy as np
from jax.experimental import pallas as pl
from jax.experimental.pallas import tpu as pltpu


def _se_kernel(x_ref, w1_ref, w2_ref, o_ref, *, inv_hw, c_chunks, hw_chunks):
    # x_ref / o_ref: (bb, C, HW)   w1_ref: (C, Cr)   w2_ref: (Cr, C)
    bb = x_ref.shape[0]

    # ---- Phase 1: squeeze (global average pool over HW), streamed chunks ----
    parts = []
    for c0, cc in c_chunks:                              # static, fully unrolled
        acc = jnp.zeros((bb, cc), jnp.float32)
        for l0, lw in hw_chunks:                         # static, fully unrolled
            xb = x_ref[:, c0:c0 + cc, l0:l0 + lw]        # static aligned slice
            acc = acc + jnp.sum(xb.astype(jnp.float32), axis=-1)  # lane reduce
        parts.append(acc)
    pooled = jnp.concatenate(parts, axis=-1) * inv_hw    # (bb, C) f32

    # ---- Excitation MLP (tiny, once per grid step): FC -> ReLU -> FC -> sigmoid
    h = jnp.dot(pooled, w1_ref[...], preferred_element_type=jnp.float32)
    h = jnp.maximum(h, 0.0)
    s = jax.nn.sigmoid(jnp.dot(h, w2_ref[...], preferred_element_type=jnp.float32))
    s = s.astype(o_ref.dtype)                            # gate in the stream dtype

    # ---- Phase 2: scale x by the per-channel gate, streamed chunks ----
    for c0, cc in c_chunks:
        g = s[:, c0:c0 + cc][:, :, None]                 # (bb, cc, 1) lane splat
        for l0, lw in hw_chunks:
            xb = x_ref[:, c0:c0 + cc, l0:l0 + lw]
            o_ref[:, c0:c0 + cc, l0:l0 + lw] = xb * g


def se_layer(x_nchw, w1, w2):
    """x_nchw: (B, C, H, W). w1: (C, C//r). w2: (C//r, C). Both Linear, bias=False."""
    b, c, h, w = x_nchw.shape
    cr = w1.shape[1]
    assert w1.shape == (c, cr) and w2.shape == (cr, c)
    hw = h * w
    itemsize = jnp.dtype(x_nchw.dtype).itemsize

    # Native layout: (B, C, HW) is a free reshape (no HBM transpose).
    x = x_nchw.reshape(b, c, hw)

    # Per-generation VMEM budget: ~96 MiB on v5e/v6e (128 MiB), ~48 MiB on v7x (64 MiB).
    try:
        vmem_cap = int(pltpu.get_tpu_info().vmem_capacity_bytes)
    except Exception:
        vmem_cap = 64 << 20
    vmem_limit = min((vmem_cap * 3) // 4, 112 << 20)

    # batch_block: largest divisor of B (<= 8) whose double-buffered in+out blocks fit.
    slab_bytes = c * hw * itemsize
    weight_bytes = (w1.size + w2.size) * jnp.dtype(w1.dtype).itemsize
    budget = (vmem_limit - 2 * weight_bytes - (2 << 20)) // 4   # 2 bufs x (in + out)
    if slab_bytes > budget:
        # TODO(synk): fallback that tiles HW onto a second grid axis (pool accumulated
        # in VMEM scratch with pl.when init/finalize, then a second scaling pass) for
        # layers where a single (C, HW) slab exceeds the VMEM budget.
        raise NotImplementedError("SE slab too large for a single VMEM block")
    batch_block = 1
    for bb in range(min(b, 8), 0, -1):
        if b % bb == 0 and bb * slab_bytes <= budget:
            batch_block = bb
            break

    # Streaming chunks: ~128 KiB (= 32 f32 vregs) per slice regardless of dtype.
    chunk_bytes = 128 * 1024
    sub = 16 if itemsize < 4 else 8                      # sublane packing of the dtype
    if hw * batch_block * sub * itemsize <= chunk_bytes:
        lw = hw                                          # full lane extent per slice
    else:
        lw = max(128, (chunk_bytes // (batch_block * sub * itemsize)) // 128 * 128)
    hw_chunks = []
    l0 = 0
    while l0 < hw:
        hw_chunks.append((l0, min(lw, hw - l0)))
        l0 += lw
    if c % sub == 0:
        cc = (chunk_bytes // itemsize) // max(batch_block * lw, 1)
        cc = min(c, max(sub, (cc // sub) * sub))         # tail stays a multiple of sub
    else:
        cc = c                                           # rare: single full-C chunk
    c_chunks = []
    c0 = 0
    while c0 < c:
        c_chunks.append((c0, min(cc, c - c0)))
        c0 += cc

    cost = pl.CostEstimate(
        flops=2 * b * c * hw + 4 * b * c * cr,           # pool adds + scale muls + MLP
        transcendentals=b * c,                           # sigmoid
        bytes_accessed=2 * b * c * hw * itemsize + 2 * weight_bytes,
    )

    block = (batch_block, c, hw)
    out = pl.pallas_call(
        functools.partial(_se_kernel, inv_hw=1.0 / hw,
                          c_chunks=tuple(c_chunks), hw_chunks=tuple(hw_chunks)),
        out_shape=jax.ShapeDtypeStruct((b, c, hw), x.dtype),
        grid=(b // batch_block,),
        in_specs=[
            pl.BlockSpec(block, lambda i: (i, 0, 0)),
            pl.BlockSpec((c, cr), lambda i: (0, 0)),     # weights: resident, untiled
            pl.BlockSpec((cr, c), lambda i: (0, 0)),
        ],
        out_specs=pl.BlockSpec(block, lambda i: (i, 0, 0)),
        compiler_params=pltpu.CompilerParams(
            # TODO(synk): switch to pltpu.CORE_PARALLEL on v7x (2 TCs) once a profile
            # confirms plain "parallel" does not already shard the batch axis.
            dimension_semantics=("parallel",),
            vmem_limit_bytes=vmem_limit,
        ),
        cost_estimate=cost,
    )(x, w1, w2)

    return out.reshape(b, c, h, w)


def se_reference(x_nchw, w1, w2):
    pooled = jnp.mean(x_nchw, axis=(2, 3))                      # (B, C)
    hmid = jnp.maximum(pooled @ w1, 0.0)                        # (B, C//r)
    s = jax.nn.sigmoid(hmid @ w2)                               # (B, C)
    return x_nchw * s[:, :, None, None]


if __name__ == "__main__":
    # C=128 keeps the lane-dense gate path representative; HW=576 exercises both
    # the full C-chunk streaming (5 chunks of 24 rows) and the sublane-aligned tail.
    B, C, H, W = 2, 128, 24, 24
    reduction = 16
    Cr = C // reduction

    key = jax.random.PRNGKey(0)
    kx, k1, k2 = jax.random.split(key, 3)

    x = jax.random.normal(kx, (B, C, H, W), dtype=jnp.float32)
    # Deterministic "Linear" weights (bias=False), stored pre-transposed for x @ W.
    w1 = (jax.random.normal(k1, (C, Cr), dtype=jnp.float32) / np.sqrt(C)).astype(jnp.float32)
    w2 = (jax.random.normal(k2, (Cr, C), dtype=jnp.float32) / np.sqrt(Cr)).astype(jnp.float32)

    out = jax.block_until_ready(se_layer(x, w1, w2))
    ref = jax.block_until_ready(se_reference(x, w1, w2))
    np.testing.assert_allclose(np.asarray(out), np.asarray(ref), rtol=1e-5, atol=1e-5)

    print("KERNEL_OK")
</pallas_src>

<mosaic_0001>
module attributes {stable_mosaic.version = 11 : i64} {
  func.func @_se_kernel(%arg0: i32, %arg1: memref<2x128x576xf32, #tpu.memory_space<vmem>>, %arg2: memref<128x8xf32, #tpu.memory_space<vmem>>, %arg3: memref<8x128xf32, #tpu.memory_space<vmem>>, %arg4: memref<2x128x576xf32, #tpu.memory_space<vmem>>) attributes {dimension_semantics = [#tpu.dimension_semantics<parallel>], iteration_bounds = array<i64: 1>, scalar_prefetch = 0 : i64, scratch_operands = 0 : i64, tpu.core_type = #tpu.core_type<tc>, window_params = [{transform_indices = @transform_0, window_bounds = array<i64: 2, 128, 576>}, {pipeline_mode = #tpu.pipeline_mode<synchronous>, transform_indices = @transform_1, window_bounds = array<i64: 128, 8>}, {pipeline_mode = #tpu.pipeline_mode<synchronous>, transform_indices = @transform_2, window_bounds = array<i64: 8, 128>}, {transform_indices = @transform_3, window_bounds = array<i64: 2, 128, 576>}]} {
    %cst = arith.constant 0.000000e+00 : f32
    %0 = vector.broadcast %cst : f32 to vector<2x24xf32>
    %c0 = arith.constant 0 : index
    %c0_0 = arith.constant 0 : index
    %c0_1 = arith.constant 0 : index
    %1 = vector.load %arg1[%c0, %c0_0, %c0_1] : memref<2x128x576xf32, #tpu.memory_space<vmem>>, vector<2x24x576xf32>
    %cst_2 = arith.constant dense<0.000000e+00> : vector<2x24xf32>
    %2 = vector.multi_reduction <add>, %1, %cst_2 [2] : vector<2x24x576xf32> to vector<2x24xf32>
    %3 = arith.addf %0, %2 : vector<2x24xf32>
    %cst_3 = arith.constant 0.000000e+00 : f32
    %4 = vector.broadcast %cst_3 : f32 to vector<2x24xf32>
    %c0_4 = arith.constant 0 : index
    %c24 = arith.constant 24 : index
    %c0_5 = arith.constant 0 : index
    %5 = vector.load %arg1[%c0_4, %c24, %c0_5] : memref<2x128x576xf32, #tpu.memory_space<vmem>>, vector<2x24x576xf32>
    %cst_6 = arith.constant dense<0.000000e+00> : vector<2x24xf32>
    %6 = vector.multi_reduction <add>, %5, %cst_6 [2] : vector<2x24x576xf32> to vector<2x24xf32>
    %7 = arith.addf %4, %6 : vector<2x24xf32>
    %cst_7 = arith.constant 0.000000e+00 : f32
    %8 = vector.broadcast %cst_7 : f32 to vector<2x24xf32>
    %c0_8 = arith.constant 0 : index
    %c48 = arith.constant 48 : index
    %c0_9 = arith.constant 0 : index
    %9 = vector.load %arg1[%c0_8, %c48, %c0_9] : memref<2x128x576xf32, #tpu.memory_space<vmem>>, vector<2x24x576xf32>
    %cst_10 = arith.constant dense<0.000000e+00> : vector<2x24xf32>
    %10 = vector.multi_reduction <add>, %9, %cst_10 [2] : vector<2x24x576xf32> to vector<2x24xf32>
    %11 = arith.addf %8, %10 : vector<2x24xf32>
    %cst_11 = arith.constant 0.000000e+00 : f32
    %12 = vector.broadcast %cst_11 : f32 to vector<2x24xf32>
    %c0_12 = arith.constant 0 : index
    %c72 = arith.constant 72 : index
    %c0_13 = arith.constant 0 : index
    %13 = vector.load %arg1[%c0_12, %c72, %c0_13] : memref<2x128x576xf32, #tpu.memory_space<vmem>>, vector<2x24x576xf32>
    %cst_14 = arith.constant dense<0.000000e+00> : vector<2x24xf32>
    %14 = vector.multi_reduction <add>, %13, %cst_14 [2] : vector<2x24x576xf32> to vector<2x24xf32>
    %15 = arith.addf %12, %14 : vector<2x24xf32>
    %cst_15 = arith.constant 0.000000e+00 : f32
    %16 = vector.broadcast %cst_15 : f32 to vector<2x24xf32>
    %c0_16 = arith.constant 0 : index
    %c96 = arith.constant 96 : index
    %c0_17 = arith.constant 0 : index
    %17 = vector.load %arg1[%c0_16, %c96, %c0_17] : memref<2x128x576xf32, #tpu.memory_space<vmem>>, vector<2x24x576xf32>
    %cst_18 = arith.constant dense<0.000000e+00> : vector<2x24xf32>
    %18 = vector.multi_reduction <add>, %17, %cst_18 [2] : vector<2x24x576xf32> to vector<2x24xf32>
    %19 = arith.addf %16, %18 : vector<2x24xf32>
    %cst_19 = arith.constant 0.000000e+00 : f32
    %20 = vector.broadcast %cst_19 : f32 to vector<2x8xf32>
    %c0_20 = arith.constant 0 : index
    %c120 = arith.constant 120 : index
    %c0_21 = arith.constant 0 : index
    %21 = vector.load %arg1[%c0_20, %c120, %c0_21] : memref<2x128x576xf32, #tpu.memory_space<vmem>>, vector<2x8x576xf32>
    %cst_22 = arith.constant dense<0.000000e+00> : vector<2x8xf32>
    %22 = vector.multi_reduction <add>, %21, %cst_22 [2] : vector<2x8x576xf32> to vector<2x8xf32>
    %23 = arith.addf %20, %22 : vector<2x8xf32>
    %24 = tpu.concatenate %3, %7, %11, %15, %19, %23 in 1 : vector<2x24xf32>, vector<2x24xf32>, vector<2x24xf32>, vector<2x24xf32>, vector<2x24xf32>, vector<2x8xf32> -> vector<2x128xf32>
    %cst_23 = arith.constant 0.00173611112 : f32
    %25 = vector.broadcast %cst_23 : f32 to vector<2x128xf32>
    %26 = arith.mulf %24, %25 : vector<2x128xf32>
    %c0_24 = arith.constant 0 : index
    %c0_25 = arith.constant 0 : index
    %27 = vector.load %arg2[%c0_24, %c0_25] : memref<128x8xf32, #tpu.memory_space<vmem>>, vector<128x8xf32>
    %cst_26 = arith.constant dense<0.000000e+00> : vector<2x8xf32>
    %28 = tpu.matmul %26, %27, %cst_26 {dimension_numbers = #tpu.dot_dimension_numbers<[1], [0], [0], [1], [0, 0, 1, 1], [], []>} : vector<2x128xf32>, vector<128x8xf32>, vector<2x8xf32> -> vector<2x8xf32>
    %cst_27 = arith.constant 0.000000e+00 : f32
    %29 = vector.broadcast %cst_27 : f32 to vector<2x8xf32>
    %30 = arith.maximumf %28, %29 : vector<2x8xf32>
    %c0_28 = arith.constant 0 : index
    %c0_29 = arith.constant 0 : index
    %31 = vector.load %arg3[%c0_28, %c0_29] : memref<8x128xf32, #tpu.memory_space<vmem>>, vector<8x128xf32>
    %cst_30 = arith.constant dense<0.000000e+00> : vector<2x128xf32>
    %32 = tpu.matmul %30, %31, %cst_30 {dimension_numbers = #tpu.dot_dimension_numbers<[1], [0], [0], [1], [0, 0, 1, 1], [], []>} : vector<2x8xf32>, vector<8x128xf32>, vector<2x128xf32> -> vector<2x128xf32>
    %33 = arith.negf %32 : vector<2x128xf32>
    %34 = math.exp %33 : vector<2x128xf32>
    %cst_31 = arith.constant 1.000000e+00 : f32
    %35 = vector.broadcast %cst_31 : f32 to vector<2x128xf32>
    %36 = arith.addf %35, %34 : vector<2x128xf32>
    %37 = arith.divf %35, %36 : vector<2x128xf32>
    %38 = vector.extract_strided_slice %37 {offsets = [0, 0], sizes = [2, 24], strides = [1, 1]} : vector<2x128xf32> to vector<2x24xf32>
    %39 = vector.shape_cast %38 : vector<2x24xf32> to vector<2x24x1xf32>
    %c0_32 = arith.constant 0 : index
    %c0_33 = arith.constant 0 : index
    %c0_34 = arith.constant 0 : index
    %40 = vector.load %arg1[%c0_32, %c0_33, %c0_34] : memref<2x128x576xf32, #tpu.memory_space<vmem>>, vector<2x24x576xf32>
    %41 = vector.broadcast %39 : vector<2x24x1xf32> to vector<2x24x576xf32>
    %42 = arith.mulf %40, %41 : vector<2x24x576xf32>
    %c0_35 = arith.constant 0 : index
    %c0_36 = arith.constant 0 : index
    %c0_37 = arith.constant 0 : index
    %43 = vector.load %arg4[%c0_35, %c0_36, %c0_37] : memref<2x128x576xf32, #tpu.memory_space<vmem>>, vector<2x24x576xf32>
    tpu.vector_store %arg4[%c0_35, %c0_36, %c0_37], %42 {strides = array<i32>} : memref<2x128x576xf32, #tpu.memory_space<vmem>>, vector<2x24x576xf32>,
    %44 = vector.extract_strided_slice %37 {offsets = [0, 24], sizes = [2, 24], strides = [1, 1]} : vector<2x128xf32> to vector<2x24xf32>
    %45 = vector.shape_cast %44 : vector<2x24xf32> to vector<2x24x1xf32>
    %c0_38 = arith.constant 0 : index
    %c24_39 = arith.constant 24 : index
    %c0_40 = arith.constant 0 : index
    %46 = vector.load %arg1[%c0_38, %c24_39, %c0_40] : memref<2x128x576xf32, #tpu.memory_space<vmem>>, vector<2x24x576xf32>
    %47 = vector.broadcast %45 : vector<2x24x1xf32> to vector<2x24x576xf32>
    %48 = arith.mulf %46, %47 : vector<2x24x576xf32>
    %c0_41 = arith.constant 0 : index
    %c24_42 = arith.constant 24 : index
    %c0_43 = arith.constant 0 : index
    %49 = vector.load %arg4[%c0_41, %c24_42, %c0_43] : memref<2x128x576xf32, #tpu.memory_space<vmem>>, vector<2x24x576xf32>
    tpu.vector_store %arg4[%c0_41, %c24_42, %c0_43], %48 {strides = array<i32>} : memref<2x128x576xf32, #tpu.memory_space<vmem>>, vector<2x24x576xf32>,
    %50 = vector.extract_strided_slice %37 {offsets = [0, 48], sizes = [2, 24], strides = [1, 1]} : vector<2x128xf32> to vector<2x24xf32>
    %51 = vector.shape_cast %50 : vector<2x24xf32> to vector<2x24x1xf32>
    %c0_44 = arith.constant 0 : index
    %c48_45 = arith.constant 48 : index
    %c0_46 = arith.constant 0 : index
    %52 = vector.load %arg1[%c0_44, %c48_45, %c0_46] : memref<2x128x576xf32, #tpu.memory_space<vmem>>, vector<2x24x576xf32>
    %53 = vector.broadcast %51 : vector<2x24x1xf32> to vector<2x24x576xf32>
    %54 = arith.mulf %52, %53 : vector<2x24x576xf32>
    %c0_47 = arith.constant 0 : index
    %c48_48 = arith.constant 48 : index
    %c0_49 = arith.constant 0 : index
    %55 = vector.load %arg4[%c0_47, %c48_48, %c0_49] : memref<2x128x576xf32, #tpu.memory_space<vmem>>, vector<2x24x576xf32>
    tpu.vector_store %arg4[%c0_47, %c48_48, %c0_49], %54 {strides = array<i32>} : memref<2x128x576xf32, #tpu.memory_space<vmem>>, vector<2x24x576xf32>,
    %56 = vector.extract_strided_slice %37 {offsets = [0, 72], sizes = [2, 24], strides = [1, 1]} : vector<2x128xf32> to vector<2x24xf32>
    %57 = vector.shape_cast %56 : vector<2x24xf32> to vector<2x24x1xf32>
    %c0_50 = arith.constant 0 : index
    %c72_51 = arith.constant 72 : index
    %c0_52 = arith.constant 0 : index
    %58 = vector.load %arg1[%c0_50, %c72_51, %c0_52] : memref<2x128x576xf32, #tpu.memory_space<vmem>>, vector<2x24x576xf32>
    %59 = vector.broadcast %57 : vector<2x24x1xf32> to vector<2x24x576xf32>
    %60 = arith.mulf %58, %59 : vector<2x24x576xf32>
    %c0_53 = arith.constant 0 : index
    %c72_54 = arith.constant 72 : index
    %c0_55 = arith.constant 0 : index
    %61 = vector.load %arg4[%c0_53, %c72_54, %c0_55] : memref<2x128x576xf32, #tpu.memory_space<vmem>>, vector<2x24x576xf32>
    tpu.vector_store %arg4[%c0_53, %c72_54, %c0_55], %60 {strides = array<i32>} : memref<2x128x576xf32, #tpu.memory_space<vmem>>, vector<2x24x576xf32>,
    %62 = vector.extract_strided_slice %37 {offsets = [0, 96], sizes = [2, 24], strides = [1, 1]} : vector<2x128xf32> to vector<2x24xf32>
    %63 = vector.shape_cast %62 : vector<2x24xf32> to vector<2x24x1xf32>
    %c0_56 = arith.constant 0 : index
    %c96_57 = arith.constant 96 : index
    %c0_58 = arith.constant 0 : index
    %64 = vector.load %arg1[%c0_56, %c96_57, %c0_58] : memref<2x128x576xf32, #tpu.memory_space<vmem>>, vector<2x24x576xf32>
    %65 = vector.broadcast %63 : vector<2x24x1xf32> to vector<2x24x576xf32>
    %66 = arith.mulf %64, %65 : vector<2x24x576xf32>
    %c0_59 = arith.constant 0 : index
    %c96_60 = arith.constant 96 : index
    %c0_61 = arith.constant 0 : index
    %67 = vector.load %arg4[%c0_59, %c96_60, %c0_61] : memref<2x128x576xf32, #tpu.memory_space<vmem>>, vector<2x24x576xf32>
    tpu.vector_store %arg4[%c0_59, %c96_60, %c0_61], %66 {strides = array<i32>} : memref<2x128x576xf32, #tpu.memory_space<vmem>>, vector<2x24x576xf32>,
    %68 = vector.extract_strided_slice %37 {offsets = [0, 120], sizes = [2, 8], strides = [1, 1]} : vector<2x128xf32> to vector<2x8xf32>
    %69 = vector.shape_cast %68 : vector<2x8xf32> to vector<2x8x1xf32>
    %c0_62 = arith.constant 0 : index
    %c120_63 = arith.constant 120 : index
    %c0_64 = arith.constant 0 : index
    %70 = vector.load %arg1[%c0_62, %c120_63, %c0_64] : memref<2x128x576xf32, #tpu.memory_space<vmem>>, vector<2x8x576xf32>
    %71 = vector.broadcast %69 : vector<2x8x1xf32> to vector<2x8x576xf32>
    %72 = arith.mulf %70, %71 : vector<2x8x576xf32>
    %c0_65 = arith.constant 0 : index
    %c120_66 = arith.constant 120 : index
    %c0_67 = arith.constant 0 : index
    %73 = vector.load %arg4[%c0_65, %c120_66, %c0_67] : memref<2x128x576xf32, #tpu.memory_space<vmem>>, vector<2x8x576xf32>
    tpu.vector_store %arg4[%c0_65, %c120_66, %c0_67], %72 {strides = array<i32>} : memref<2x128x576xf32, #tpu.memory_space<vmem>>, vector<2x8x576xf32>,
    return
  }
  func.func @transform_0(%arg0: i32) -> (i32, i32, i32) {
    %c0_i32 = arith.constant 0 : i32
    %c0_i32_0 = arith.constant 0 : i32
    %c0_i32_1 = arith.constant 0 : i32
    return %arg0, %c0_i32, %c0_i32_0 : i32, i32, i32
  }
  func.func @transform_1(%arg0: i32) -> (i32, i32) {
    %c0_i32 = arith.constant 0 : i32
    %c0_i32_0 = arith.constant 0 : i32
    %c0_i32_1 = arith.constant 0 : i32
    return %c0_i32, %c0_i32_0 : i32, i32
  }
  func.func @transform_2(%arg0: i32) -> (i32, i32) {
    %c0_i32 = arith.constant 0 : i32
    %c0_i32_0 = arith.constant 0 : i32
    %c0_i32_1 = arith.constant 0 : i32
    return %c0_i32, %c0_i32_0 : i32, i32
  }
  func.func @transform_3(%arg0: i32) -> (i32, i32, i32) {
    %c0_i32 = arith.constant 0 : i32
    %c0_i32_0 = arith.constant 0 : i32
    %c0_i32_1 = arith.constant 0 : i32
    return %arg0, %c0_i32, %c0_i32_0 : i32, i32, i32
  }
}

</mosaic_0001>

<bundles_post_ra>
// kernel: tpu_custom_call.1
= control target key start
LH: loop header
LB: loop body
LE: loop exit
PB: predicated region body
PF: predicated region fallthrough
CT: control target
= control target key end

     0   :  { %vm47_vm0 = vcmask 523264   ;;  %vm1541_vm1 = vmmov 0   ;;  %vm448_vm2 = vcmask 130112   ;;  %vm490_vm3 = vcmask 326912   ;;  %s3261_s0 = inlined_call_operand.vmem [shape: f32[2,128,576], index: 0, kind: input, shape index: {}]   ;;  %s3262_s1 = inlined_call_operand.vmem [shape: f32[128,8], index: 1, kind: input, shape index: {}]   ;;  %s3263_s2 = inlined_call_operand.vmem [shape: f32[8,128], index: 2, kind: input, shape index: {}]   ;;  %s3264_s3 = inlined_call_operand.vmem [shape: f32[2,128,576], index: 3, kind: output, shape index: {}]  }
   0x1   :  { %v29_v0 = vld [vmem:[%s3261_s0 + $0x280] sm:$0xff]  ;;  %v30_v1 = vld [vmem:[%s3261_s0 + $0x288] sm:$0xff]  ;;  %v31_v2 = vld [vmem:[%s3261_s0 + $0x290] sm:$0xff]  ;;  %vm455_vm4 = vcmask 195712   ;;  %vm497_vm5 = vcmask 392512   ;;  %vm531_vm6 = vcmask 523712  }
   0x2   :  { %v32_v3 = vld [vmem:[%s3261_s0 + $0x298] sm:$0xff]  ;;  %v33_v4 = vld [vmem:[%s3261_s0 + $0x2a0] sm:$0xff]  ;;  %v66_v5 = vadd.f32 %v30_v1, %v29_v0  ;;  %v15_v7 = vld [vmem:[%s3261_s0 + $0x8] sm:$0xff]  ;;  %vm538_vm7 = vcmask 589312   ;;  %vm572_vm8 = vcmask 720512   ;;  %vm579_vm9 = vcmask 786112  }
   0x3   :  { %v14_v6 = vld [vmem:[%s3261_s0] sm:$0xff]  ;;  %v16_v8 = vld [vmem:[%s3261_s0 + $0x10] sm:$0xff]  ;;  %v17_v9 = vld [vmem:[%s3261_s0 + $0x18] sm:$0xff]  ;;  %v69_v15 = vsel %vm47_vm0, %v33_v4, 0.0  ;;  %vm613_vm10 = vcmask 917312   ;;  %vm620_vm11 = vcmask 982912  }
   0x4   :  { %v67_v10 = vadd.f32 %v66_v5, %v31_v2  ;;  %v18_v11 = vld [vmem:[%s3261_s0 + $0x20] sm:$0xff]  ;;  %v44_v12 = vadd.f32 %v15_v7, %v14_v6  ;;  %v34_v13 = vld [vmem:[%s3261_s0 + $0x2a8] sm:$0xff]  ;;  %v35_v14 = vld [vmem:[%s3261_s0 + $0x2b0] sm:$0xff]  ;;  %vm471_vm12 = vcmask 1041409   ;;  %vm651_vm13 = vcmask 195584  }
   0x5   :  { %v36_v16 = vld [vmem:[%s3261_s0 + $0x2b8] sm:$0xff]  ;;  %v37_v17 = vld [vmem:[%s3261_s0 + $0x2c0] sm:$0xff]  ;;  %v38_v18 = vld [vmem:[%s3261_s0 + $0x2c8] sm:$0xff]  ;;  %v73_v19 = vadd.f32 %v35_v14, %v34_v13  ;;  %v48_v25 = vsel %vm47_vm0, %v18_v11, 0.0  ;;  %vm653_vm14 = vcmask 392192   ;;  %vm655_vm15 = vcmask 588800  }
   0x6   :  { %v68_v20 = vadd.f32 %v67_v10, %v32_v3  ;;  %v45_v21 = vadd.f32 %v44_v12, %v16_v8  ;;  %v19_v22 = vld [vmem:[%s3261_s0 + $0x28] sm:$0xff]  ;;  %v20_v23 = vld [vmem:[%s3261_s0 + $0x30] sm:$0xff]  ;;  %v21_v24 = vld [vmem:[%s3261_s0 + $0x38] sm:$0xff]  ;;  %v76_v33 = vsel %vm47_vm0, %v38_v18, 0.0 }
   0x7   :  { %v74_v26 = vadd.f32 %v73_v19, %v36_v16  ;;  %v22_v27 = vld [vmem:[%s3261_s0 + $0x40] sm:$0xff]  ;;  %v23_v28 = vld [vmem:[%s3261_s0 + $0x48] sm:$0xff]  ;;  %v52_v29 = vadd.f32 %v20_v23, %v19_v22  ;;  %v100_v35 = vld [vmem:[%s3261_s0 + $0xb0] sm:$0xff] }
   0x8   :  { %v98_v30 = vld [vmem:[%s3261_s0 + $0xa0] sm:$0xff]  ;;  %v70_v31 = vadd.f32 %v69_v15, %v68_v20  ;;  %v46_v32 = vadd.f32 %v45_v21, %v17_v9  ;;  %v99_v34 = vld [vmem:[%s3261_s0 + $0xa8] sm:$0xff]  ;;  %v101_v36 = vld [vmem:[%s3261_s0 + $0xb8] sm:$0xff]  ;;  %v55_v44 = vsel %vm47_vm0, %v23_v28, 0.0 }
   0x9   :  { %v75_v37 = vadd.f32 %v74_v26, %v37_v17  ;;  %v53_v38 = vadd.f32 %v52_v29, %v21_v24  ;;  %v102_v39 = vld [vmem:[%s3261_s0 + $0xc0] sm:$0xff]  ;;  %v130_v40 = vadd.f32 %v99_v34, %v98_v30  ;;  %v93_v41 = vld [vmem:[%s3261_s0 + $0x78] sm:$0xff]  ;;  %v95_v45 = vld [vmem:[%s3261_s0 + $0x88] sm:$0xff] }
   0xa   :  { %v94_v42 = vld [vmem:[%s3261_s0 + $0x80] sm:$0xff]  ;;  %71 = vadd.xlane.f32.xlu1 %v70_v31  ;;  %v49_v43 = vadd.f32 %v48_v25, %v46_v32  ;;  %v96_v46 = vld [vmem:[%s3261_s0 + $0x90] sm:$0xff]  ;;  %v97_v47 = vld [vmem:[%s3261_s0 + $0x98] sm:$0xff]  ;;  %v133_v55 = vsel %vm47_vm0, %v102_v39, 0.0 }
   0xb   :  { %v123_v48 = vadd.f32 %v94_v42, %v93_v41  ;;  %v77_v49 = vadd.f32 %v76_v33, %v75_v37  ;;  %v54_v50 = vadd.f32 %v53_v38, %v22_v27  ;;  %v131_v51 = vadd.f32 %v130_v40, %v100_v35  ;;  %v113_v52 = vld [vmem:[%s3261_s0 + $0x320] sm:$0xff]  ;;  %v114_v53 = vld [vmem:[%s3261_s0 + $0x328] sm:$0xff]  ;;  %v115_v54 = vld [vmem:[%s3261_s0 + $0x330] sm:$0xff] }
   0xc   :  { %50 = vadd.xlane.f32.xlu0 %v49_v43  ;;  %v116_v57 = vld [vmem:[%s3261_s0 + $0x338] sm:$0xff]  ;;  %v117_v58 = vld [vmem:[%s3261_s0 + $0x340] sm:$0xff]  ;;  %v151_v59 = vadd.f32 %v114_v53, %v113_v52  ;;  %v126_v63 = vsel %vm47_vm0, %v97_v47, 0.0  ;;  %v110_v1 = vld [vmem:[%s3261_s0 + $0x308] sm:$0xff] }
   0xd   :  { %v124_v56 = vadd.f32 %v123_v48, %v95_v45  ;;  %v108_v60 = vld [vmem:[%s3261_s0 + $0x2f8] sm:$0xff]  ;;  %v56_v61 = vadd.f32 %v55_v44, %v54_v50  ;;  %v132_v62 = vadd.f32 %v131_v51, %v101_v36  ;;  %v109_v0 = vld [vmem:[%s3261_s0 + $0x300] sm:$0xff]  ;;  %v111_v2 = vld [vmem:[%s3261_s0 + $0x310] sm:$0xff]  ;;  %v154_v10 = vsel %vm47_vm0, %v117_v58, 0.0 }
   0xe   :  { %78 = vadd.xlane.f32.xlu1 %v77_v49  ;;  %v152_v4 = vadd.f32 %v151_v59, %v115_v54  ;;  %v112_v5 = vld [vmem:[%s3261_s0 + $0x318] sm:$0xff]  ;;  %v144_v6 = vadd.f32 %v109_v0, %v108_v60  ;;  %v39_v7 = vld [vmem:[%s3261_s0 + $0x2d0] sm:$0xff]  ;;  %v41_v11 = vld [vmem:[%s3261_s0 + $0x2e0] sm:$0xff] }
   0xf   :  { %v125_v3 = vadd.f32 %v124_v56, %v96_v46  ;;  %v40_v8 = vld [vmem:[%s3261_s0 + $0x2d8] sm:$0xff]  ;;  %v134_v9 = vadd.f32 %v133_v55, %v132_v62  ;;  %v42_v12 = vld [vmem:[%s3261_s0 + $0x2e8] sm:$0xff]  ;;  %v43_v13 = vld [vmem:[%s3261_s0 + $0x2f0] sm:$0xff]  ;;  %v147_v21 = vsel %vm47_vm0, %v112_v5, 0.0 }
  0x10   :  { %v80_v14 = vadd.f32 %v40_v8, %v39_v7  ;;  %57 = vadd.xlane.f32.xlu0 %v56_v61  ;;  %v153_v16 = vadd.f32 %v152_v4, %v116_v57  ;;  %v145_v17 = vadd.f32 %v144_v6, %v110_v1  ;;  %v24_v18 = vld [vmem:[%s3261_s0 + $0x50] sm:$0xff]  ;;  %v25_v19 = vld [vmem:[%s3261_s0 + $0x58] sm:$0xff]  ;;  %v26_v20 = vld [vmem:[%s3261_s0 + $0x60] sm:$0xff]  ;;  %v83_v32 = vsel %vm47_vm0, %v43_v13, 0.0 }
  0x11   :  { %v127_v15 = vadd.f32 %v126_v63, %v125_v3  ;;  %v27_v23 = vld [vmem:[%s3261_s0 + $0x68] sm:$0xff]  ;;  %v59_v24 = vadd.f32 %v25_v19, %v24_v18  ;;  %v28_v28 = vld [vmem:[%s3261_s0 + $0x70] sm:$0xff]  ;;  %v120_v30 = vld [vmem:[%s3261_s0 + $0x358] sm:$0xff] }
  0x12   :  { %v81_v22 = vadd.f32 %v80_v14, %v41_v11  ;;  %v118_v25 = vld [vmem:[%s3261_s0 + $0x348] sm:$0xff]  ;;  %135 = vadd.xlane.f32.xlu1 %v134_v9  ;;  %v155_v26 = vadd.f32 %v154_v10, %v153_v16  ;;  %v146_v27 = vadd.f32 %v145_v17, %v111_v2  ;;  %v119_v29 = vld [vmem:[%s3261_s0 + $0x350] sm:$0xff]  ;;  %v121_v34 = vld [vmem:[%s3261_s0 + $0x360] sm:$0xff]  ;;  %v62_v44 = vsel %vm47_vm0, %v28_v28, 0.0 }
  0x13   :  { %v60_v33 = vadd.f32 %v59_v24, %v26_v20  ;;  %v158_v35 = vadd.f32 %v119_v29, %v118_v25  ;;  %v103_v36 = vld [vmem:[%s3261_s0 + $0xc8] sm:$0xff]  ;;  %v104_v37 = vld [vmem:[%s3261_s0 + $0xd0] sm:$0xff]  ;;  %v105_v40 = vld [vmem:[%s3261_s0 + $0xd8] sm:$0xff] }
  0x14   :  { %v82_v31 = vadd.f32 %v81_v22, %v42_v12  ;;  %128 = vadd.xlane.f32.xlu0 %v127_v15  ;;  %v148_v38 = vadd.f32 %v147_v21, %v146_v27  ;;  %v122_v39 = vld [vmem:[%s3261_s0 + $0x368] sm:$0xff]  ;;  %v106_v41 = vld [vmem:[%s3261_s0 + $0xe0] sm:$0xff]  ;;  %v137_v42 = vadd.f32 %v104_v37, %v103_v36  ;;  %v176_v46 = vld [vmem:[%s3261_s0 + $0x118] sm:$0xff] }
  0x15   :  { %v61_v43 = vadd.f32 %v60_v33, %v27_v23  ;;  %v159_v45 = vadd.f32 %v158_v35, %v120_v30  ;;  %v177_v47 = vld [vmem:[%s3261_s0 + $0x120] sm:$0xff]  ;;  %v178_v48 = vld [vmem:[%s3261_s0 + $0x128] sm:$0xff]  ;;  %v171_v53 = vld [vmem:[%s3261_s0 + $0xf0] sm:$0xff]  ;;  %v161_v55 = vsel %vm47_vm0, %v122_v39, 0.0 }
  0x16   :  { %156 = vadd.xlane.f32.xlu1 %v155_v26  ;;  %v84_v49 = vadd.f32 %v83_v32, %v82_v31  ;;  %v107_v50 = vld [vmem:[%s3261_s0 + $0xe8] sm:$0xff]  ;;  %v138_v51 = vadd.f32 %v137_v42, %v105_v40  ;;  %v208_v52 = vadd.f32 %v177_v47, %v176_v46  ;;  %v179_v56 = vld [vmem:[%s3261_s0 + $0x130] sm:$0xff]  ;;  %v172_v57 = vld [vmem:[%s3261_s0 + $0xf8] sm:$0xff] }
  0x17   :  { %v160_v54 = vadd.f32 %v159_v45, %v121_v34  ;;  %v173_v58 = vld [vmem:[%s3261_s0 + $0x100] sm:$0xff]  ;;  %v63_v59 = vadd.f32 %v62_v44, %v61_v43  ;;  %v180_v61 = vld [vmem:[%s3261_s0 + $0x138] sm:$0xff]  ;;  %v201_v63 = vadd.f32 %v172_v57, %v171_v53  ;;  %v140_v2 = vsel %vm47_vm0, %v107_v50, 0.0  ;;  %v174_v3 = vld [vmem:[%s3261_s0 + $0x108] sm:$0xff] }
  0x18   :  { %149 = vadd.xlane.f32.xlu0 %v148_v38  ;;  %v139_v60 = vadd.f32 %v138_v51, %v106_v41  ;;  %v209_v62 = vadd.f32 %v208_v52, %v178_v48  ;;  %v191_v0 = vld [vmem:[%s3261_s0 + $0x398] sm:$0xff]  ;;  %v192_v1 = vld [vmem:[%s3261_s0 + $0x3a0] sm:$0xff]  ;;  %v175_v4 = vld [vmem:[%s3261_s0 + $0x110] sm:$0xff]  ;;  %v211_v13 = vsel %vm47_vm0, %v180_v61, 0.0 }
  0x19   :  { %v193_v5 = vld [vmem:[%s3261_s0 + $0x3a8] sm:$0xff]  ;;  %v229_v6 = vadd.f32 %v192_v1, %v191_v0  ;;  %v162_v7 = vadd.f32 %v161_v55, %v160_v54  ;;  %v202_v9 = vadd.f32 %v201_v63, %v173_v58  ;;  %v186_v10 = vld [vmem:[%s3261_s0 + $0x370] sm:$0xff]  ;;  %v187_v11 = vld [vmem:[%s3261_s0 + $0x378] sm:$0xff]  ;;  %v204_v23 = vsel %vm47_vm0, %v175_v4, 0.0 }
  0x1a   :  { %85 = vadd.xlane.f32.xlu1 %v84_v49  ;;  %v210_v8 = vadd.f32 %v209_v62, %v179_v56  ;;  %v188_v12 = vld [vmem:[%s3261_s0 + $0x380] sm:$0xff]  ;;  %v194_v14 = vld [vmem:[%s3261_s0 + $0x3b0] sm:$0xff]  ;;  %v222_v16 = vadd.f32 %v187_v11, %v186_v10  ;;  %v141_v18 = vadd.f32 %v140_v2, %v139_v60  ;;  %v195_v20 = vld [vmem:[%s3261_s0 + $0x3b8] sm:$0xff] }
  0x1b   :  { %v230_v15 = vadd.f32 %v229_v6, %v193_v5  ;;  %v196_v17 = vld [vmem:[%s3261_s0 + $0x3c0] sm:$0xff]  ;;  %v203_v19 = vadd.f32 %v202_v9, %v174_v3  ;;  %v197_v21 = vld [vmem:[%s3261_s0 + $0x3c8] sm:$0xff]  ;;  %v198_v22 = vld [vmem:[%s3261_s0 + $0x3d0] sm:$0xff]  ;;  %v232_v35 = vsel %vm47_vm0, %v195_v20, 0.0 }
  0x1c   :  { %64 = vadd.xlane.f32.xlu0 %v63_v59  ;;  %v189_v24 = vld [vmem:[%s3261_s0 + $0x388] sm:$0xff]  ;;  %v223_v25 = vadd.f32 %v222_v16, %v188_v12  ;;  %v236_v26 = vadd.f32 %v197_v21, %v196_v17  ;;  %v181_v27 = vld [vmem:[%s3261_s0 + $0x140] sm:$0xff]  ;;  %v212_v29 = vadd.f32 %v211_v13, %v210_v8  ;;  %v190_v31 = vld [vmem:[%s3261_s0 + $0x390] sm:$0xff] }
  0x1d   :  { %v182_v28 = vld [vmem:[%s3261_s0 + $0x148] sm:$0xff]  ;;  %v231_v30 = vadd.f32 %v230_v15, %v194_v14  ;;  %v199_v32 = vld [vmem:[%s3261_s0 + $0x3d8] sm:$0xff]  ;;  %v183_v33 = vld [vmem:[%s3261_s0 + $0x150] sm:$0xff]  ;;  %v205_v40 = vadd.f32 %v204_v23, %v203_v19  ;;  %v225_v46 = vsel %vm47_vm0, %v190_v31, 0.0 }
  0x1e   :  { %163 = vadd.xlane.f32.xlu1 %v162_v7  ;;  %v215_v34 = vadd.f32 %v182_v28, %v181_v27  ;;  %v237_v36 = vadd.f32 %v236_v26, %v198_v22  ;;  %v254_v37 = vld [vmem:[%s3261_s0 + $0x190] sm:$0xff]  ;;  %v255_v38 = vld [vmem:[%s3261_s0 + $0x198] sm:$0xff]  ;;  %v256_v39 = vld [vmem:[%s3261_s0 + $0x1a0] sm:$0xff]  ;;  %v224_v41 = vadd.f32 %v223_v25, %v189_v24 }
  0x1f   :  { %v200_v42 = vld [vmem:[%s3261_s0 + $0x3e0] sm:$0xff]  ;;  %v286_v44 = vadd.f32 %v255_v38, %v254_v37  ;;  %v249_v45 = vld [vmem:[%s3261_s0 + $0x168] sm:$0xff]  ;;  %v184_v47 = vld [vmem:[%s3261_s0 + $0x158] sm:$0xff]  ;;  %v233_v50 = vadd.f32 %v232_v35, %v231_v30 }
  0x20   :  { %142 = vadd.xlane.f32.xlu0 %v141_v18  ;;  %v216_v43 = vadd.f32 %v215_v34, %v183_v33  ;;  %v250_v48 = vld [vmem:[%s3261_s0 + $0x170] sm:$0xff]  ;;  %v251_v49 = vld [vmem:[%s3261_s0 + $0x178] sm:$0xff]  ;;  %v238_v51 = vadd.f32 %v237_v36, %v199_v32  ;;  %v185_v52 = vld [vmem:[%s3261_s0 + $0x160] sm:$0xff]  ;;  %v239_v57 = vsel %vm47_vm0, %v200_v42, 0.0  ;;  %v226_v61 = vadd.f32 %v225_v46, %v224_v41 }
  0x21   :  { %v287_v53 = vadd.f32 %v286_v44, %v256_v39  ;;  %v279_v54 = vadd.f32 %v250_v48, %v249_v45  ;;  %v269_v55 = vld [vmem:[%s3261_s0 + $0x410] sm:$0xff]  ;;  %v270_v56 = vld [vmem:[%s3261_s0 + $0x418] sm:$0xff]  ;;  %v257_v58 = vld [vmem:[%s3261_s0 + $0x1a8] sm:$0xff]  ;;  %v218_v3 = vsel %vm47_vm0, %v185_v52, 0.0 }
  0x22   :  { %213 = vadd.xlane.f32.xlu1 %v212_v29  ;;  %v271_v59 = vld [vmem:[%s3261_s0 + $0x420] sm:$0xff]  ;;  %v307_v60 = vadd.f32 %v270_v56, %v269_v55  ;;  %v217_v62 = vadd.f32 %v216_v43, %v184_v47  ;;  %v258_v63 = vld [vmem:[%s3261_s0 + $0x1b0] sm:$0xff]  ;;  %v264_v1 = vld [vmem:[%s3261_s0 + $0x3e8] sm:$0xff]  ;;  %v240_v8 = vadd.f32 %v239_v57, %v238_v51 }
  0x23   :  { %v280_v0 = vadd.f32 %v279_v54, %v251_v49  ;;  %v265_v2 = vld [vmem:[%s3261_s0 + $0x3f0] sm:$0xff]  ;;  %v252_v4 = vld [vmem:[%s3261_s0 + $0x180] sm:$0xff]  ;;  %v266_v5 = vld [vmem:[%s3261_s0 + $0x3f8] sm:$0xff]  ;;  %v288_v9 = vadd.f32 %v287_v53, %v257_v58  ;;  %v289_v14 = vsel %vm47_vm0, %v258_v63, 0.0 }
  0x24   :  { %206 = vadd.xlane.f32.xlu0 %v205_v40  ;;  %v300_v6 = vadd.f32 %v265_v2, %v264_v1  ;;  %v274_v7 = vld [vmem:[%s3261_s0 + $0x438] sm:$0xff]  ;;  %v253_v10 = vld [vmem:[%s3261_s0 + $0x188] sm:$0xff]  ;;  %v308_v12 = vadd.f32 %v307_v60, %v271_v59  ;;  %v275_v13 = vld [vmem:[%s3261_s0 + $0x440] sm:$0xff]  ;;  %v219_v19 = vadd.f32 %v218_v3, %v217_v62 }
  0x25   :  { %v272_v11 = vld [vmem:[%s3261_s0 + $0x428] sm:$0xff]  ;;  %v314_v16 = vadd.f32 %v275_v13, %v274_v7  ;;  %v259_v17 = vld [vmem:[%s3261_s0 + $0x1b8] sm:$0xff]  ;;  %v260_v18 = vld [vmem:[%s3261_s0 + $0x1c0] sm:$0xff]  ;;  %v281_v20 = vadd.f32 %v280_v0, %v252_v4  ;;  %v282_v25 = vsel %vm47_vm0, %v253_v10, 0.0  ;;  %v290_v29 = vadd.f32 %v289_v14, %v288_v9 }
  0x26   :  { %234 = vadd.xlane.f32.xlu1 %v233_v50  ;;  %v276_v15 = vld [vmem:[%s3261_s0 + $0x448] sm:$0xff]  ;;  %v273_v21 = vld [vmem:[%s3261_s0 + $0x430] sm:$0xff]  ;;  %v267_v22 = vld [vmem:[%s3261_s0 + $0x400] sm:$0xff]  ;;  %v301_v23 = vadd.f32 %v300_v6, %v266_v5  ;;  %v293_v24 = vadd.f32 %v260_v18, %v259_v17  ;;  %v309_v30 = vadd.f32 %v308_v12, %v272_v11 }
  0x27   :  { %v261_v26 = vld [vmem:[%s3261_s0 + $0x1c8] sm:$0xff]  ;;  %v333_v28 = vld [vmem:[%s3261_s0 + $0x210] sm:$0xff]  ;;  %v315_v32 = vadd.f32 %v314_v16, %v276_v15  ;;  %v327_v34 = vld [vmem:[%s3261_s0 + $0x1e0] sm:$0xff]  ;;  %v310_v35 = vsel %vm47_vm0, %v273_v21, 0.0  ;;  %v283_v39 = vadd.f32 %v282_v25, %v281_v20 }
  0x28   :  { %227 = vadd.xlane.f32.xlu0 %v226_v61  ;;  %v332_v27 = vld [vmem:[%s3261_s0 + $0x208] sm:$0xff]  ;;  %v277_v36 = vld [vmem:[%s3261_s0 + $0x450] sm:$0xff]  ;;  %v334_v37 = vld [vmem:[%s3261_s0 + $0x218] sm:$0xff]  ;;  %v302_v40 = vadd.f32 %v301_v23, %v267_v22  ;;  %v294_v42 = vadd.f32 %v293_v24, %v261_v26  ;;  %v311_v49 = vadd.f32 %v310_v35, %v309_v30 }
  0x29   :  { %v268_v31 = vld [vmem:[%s3261_s0 + $0x408] sm:$0xff]  ;;  %v364_v33 = vadd.f32 %v333_v28, %v332_v27  ;;  %v278_v41 = vld [vmem:[%s3261_s0 + $0x458] sm:$0xff]  ;;  %v348_v45 = vld [vmem:[%s3261_s0 + $0x490] sm:$0xff]  ;;  %v316_v50 = vadd.f32 %v315_v32, %v277_v36 }
  0x2a   :  { %241 = vadd.xlane.f32.xlu1 %v240_v8  ;;  %v328_v38 = vld [vmem:[%s3261_s0 + $0x1e8] sm:$0xff]  ;;  %v303_v46 = vsel %vm47_vm0, %v268_v31, 0.0  ;;  %v262_v47 = vld [vmem:[%s3261_s0 + $0x1d0] sm:$0xff]  ;;  %v263_v51 = vld [vmem:[%s3261_s0 + $0x1d8] sm:$0xff]  ;;  %v317_v56 = vsel %vm47_vm0, %v278_v41, 0.0 }
  0x2b   :  { %v357_v43 = vadd.f32 %v328_v38, %v327_v34  ;;  %v347_v44 = vld [vmem:[%s3261_s0 + $0x488] sm:$0xff]  ;;  %v329_v48 = vld [vmem:[%s3261_s0 + $0x1f0] sm:$0xff]  ;;  %v365_v52 = vadd.f32 %v364_v33, %v334_v37  ;;  %v342_v54 = vld [vmem:[%s3261_s0 + $0x460] sm:$0xff]  ;;  %v304_v60 = vadd.f32 %v303_v46, %v302_v40  ;;  %v295_v61 = vadd.f32 %v294_v42, %v262_v47 }
  0x2c   :  { %220 = vadd.xlane.f32.xlu0 %v219_v19  ;;  %v385_v53 = vadd.f32 %v348_v45, %v347_v44  ;;  %v343_v55 = vld [vmem:[%s3261_s0 + $0x468] sm:$0xff]  ;;  %v335_v57 = vld [vmem:[%s3261_s0 + $0x220] sm:$0xff]  ;;  %v349_v58 = vld [vmem:[%s3261_s0 + $0x498] sm:$0xff]  ;;  %v296_v3 = vsel %vm47_vm0, %v263_v51, 0.0  ;;  %v318_v7 = vadd.f32 %v317_v56, %v316_v50  ;;  %v1540_v56 = vmov 0.0|0.0  }
  0x2d   :  { %v352_v59 = vld [vmem:[%s3261_s0 + $0x4b0] sm:$0xff]  ;;  %v336_v62 = vld [vmem:[%s3261_s0 + $0x228] sm:$0xff]  ;;  %v330_v63 = vld [vmem:[%s3261_s0 + $0x1f8] sm:$0xff]  ;;  %v358_v0 = vadd.f32 %v357_v43, %v329_v48  ;;  %v378_v1 = vadd.f32 %v343_v55, %v342_v54  ;;  %v366_v8 = vadd.f32 %v365_v52, %v335_v57  ;;  %v297_v17 = vadd.f32 %v296_v3, %v295_v61  ;;  %1479 = vmatprep.subr.bf16.mxu0 %v1540_v56 }
  0x2e   :  { %291 = vadd.xlane.f32.xlu1 %v290_v29  ;;  %v353_v2 = vld [vmem:[%s3261_s0 + $0x4b8] sm:$0xff]  ;;  %v344_v4 = vld [vmem:[%s3261_s0 + $0x470] sm:$0xff]  ;;  %v331_v9 = vld [vmem:[%s3261_s0 + $0x200] sm:$0xff]  ;;  %v386_v11 = vadd.f32 %v385_v53, %v349_v58  ;;  %v367_v13 = vsel %vm47_vm0, %v336_v62, 0.0 }
  0x2f   :  { %v337_v5 = vld [vmem:[%s3261_s0 + $0x230] sm:$0xff]  ;;  %v338_v6 = vld [vmem:[%s3261_s0 + $0x238] sm:$0xff]  ;;  %v350_v10 = vld [vmem:[%s3261_s0 + $0x4a0] sm:$0xff]  ;;  %v392_v12 = vadd.f32 %v353_v2, %v352_v59  ;;  %v359_v18 = vadd.f32 %v358_v0, %v330_v63  ;;  %v379_v21 = vadd.f32 %v378_v1, %v344_v4  ;;  %v360_v23 = vsel %vm47_vm0, %v331_v9, 0.0 }
  0x30   :  { %284 = vadd.xlane.f32.xlu0 %v283_v39  ;;  %v354_v14 = vld [vmem:[%s3261_s0 + $0x4c0] sm:$0xff]  ;;  %v410_v15 = vld [vmem:[%s3261_s0 + $0x4d8] sm:$0xff]  ;;  %v351_v19 = vld [vmem:[%s3261_s0 + $0x4a8] sm:$0xff]  ;;  %v371_v22 = vadd.f32 %v338_v6, %v337_v5  ;;  %v368_v27 = vadd.f32 %v367_v13, %v366_v8  ;;  %v387_v28 = vadd.f32 %v386_v11, %v350_v10 }
  0x31   :  { %v411_v16 = vld [vmem:[%s3261_s0 + $0x4e0] sm:$0xff]  ;;  %v345_v20 = vld [vmem:[%s3261_s0 + $0x478] sm:$0xff]  ;;  %v393_v30 = vadd.f32 %v392_v12, %v354_v14  ;;  %v388_v32 = vsel %vm47_vm0, %v351_v19, 0.0  ;;  %v355_v33 = vld [vmem:[%s3261_s0 + $0x4c8] sm:$0xff]  ;;  %v361_v35 = vadd.f32 %v360_v23, %v359_v18 }
  0x32   :  { %312 = vadd.xlane.f32.xlu1 %v311_v49  ;;  %v339_v24 = vld [vmem:[%s3261_s0 + $0x240] sm:$0xff]  ;;  %v405_v25 = vld [vmem:[%s3261_s0 + $0x258] sm:$0xff]  ;;  %v422_v31 = vadd.f32 %v411_v16, %v410_v15  ;;  %v412_v34 = vld [vmem:[%s3261_s0 + $0x4e8] sm:$0xff]  ;;  %v380_v36 = vadd.f32 %v379_v21, %v345_v20  ;;  %v389_v43 = vadd.f32 %v388_v32, %v387_v28 }
  0x33   :  { %v406_v26 = vld [vmem:[%s3261_s0 + $0x260] sm:$0xff]  ;;  %v356_v37 = vld [vmem:[%s3261_s0 + $0x4d0] sm:$0xff]  ;;  %v372_v38 = vadd.f32 %v371_v22, %v339_v24  ;;  %v340_v41 = vld [vmem:[%s3261_s0 + $0x248] sm:$0xff]  ;;  %v394_v44 = vadd.f32 %v393_v30, %v355_v33 }
  0x34   :  { %305 = vadd.xlane.f32.xlu0 %v304_v60  ;;  %v346_v29 = vld [vmem:[%s3261_s0 + $0x480] sm:$0xff]  ;;  %v415_v39 = vadd.f32 %v406_v26, %v405_v25  ;;  %v407_v42 = vld [vmem:[%s3261_s0 + $0x268] sm:$0xff]  ;;  %v341_v45 = vld [vmem:[%s3261_s0 + $0x250] sm:$0xff]  ;;  %v423_v46 = vadd.f32 %v422_v31, %v412_v34  ;;  %v395_v49 = vsel %vm47_vm0, %v356_v37, 0.0  ;;  %v1542_v25 = vmov 0.0  }
  0x35   :  { %v381_v40 = vsel %vm47_vm0, %v346_v29, 0.0  ;;  %v662_v47 = vld [vmem:[%s3262_s1] sm:$0xff]  ;;  %v663_v48 = vld [vmem:[%s3262_s1 + $0x8] sm:$0xff]  ;;  %v413_v50 = vld [vmem:[%s3261_s0 + $0x4f0] sm:$0xff]  ;;  %v373_v53 = vadd.f32 %v372_v38, %v340_v41  ;;  %v374_v57 = vsel %vm47_vm0, %v341_v45, 0.0  ;;  %v396_v59 = vadd.f32 %v395_v49, %v394_v44  ;;  %1471 = vmatprep.mubr.msk.f32.mxu0 %vm1541_vm1, %v1542_v25  ;;  %1474 = vmatprep.subr.mxu1 %v1542_v25 }
  0x36   :  { %319 = vadd.xlane.f32.xlu1 %v318_v7  ;;  %v1480_v51 = vpack.c.bf16 %v663_v48, %v662_v47  ;;  %v382_v52 = vadd.f32 %v381_v40, %v380_v36  ;;  %v414_v54 = vld [vmem:[%s3261_s0 + $0x4f8] sm:$0xff]  ;;  %v416_v55 = vadd.f32 %v415_v39, %v407_v42  ;;  %v408_v58 = vld [vmem:[%s3261_s0 + $0x270] sm:$0xff]  ;;  %v424_v60 = vadd.f32 %v423_v46, %v413_v50  ;;  %v666_v6 = vld [vmem:[%s3262_s1 + $0x20] sm:$0xff] }
  0x37   :  { %v409_v61 = vld [vmem:[%s3261_s0 + $0x278] sm:$0xff]  ;;  %v664_v62 = vld [vmem:[%s3262_s1 + $0x10] sm:$0xff]  ;;  %v425_v0 = vsel %vm47_vm0, %v414_v54, 0.0  ;;  %v375_v2 = vadd.f32 %v374_v57, %v373_v53  ;;  %v667_v7 = vld [vmem:[%s3262_s1 + $0x28] sm:$0xff]  ;;  %1476 = vmatprep.mubr.msk.f32.mxu1 %vm1541_vm1, %v1542_v25  ;;  %v437_v42 = vlaneseq  ;;  %vm657_vm1 = vcmask 785408  }
  0x38   :  { %298 = vadd.xlane.f32.xlu0 %v297_v17  ;;  %1481 = vmatpush3.bf16.msra.mxu0 %v1480_v51  ;;  %v665_v63 = vld [vmem:[%s3262_s1 + $0x18] sm:$0xff]  ;;  %v417_v3 = vadd.f32 %v416_v55, %v408_v58  ;;  %v418_v4 = vsel %vm47_vm0, %v409_v61, 0.0  ;;  %v426_v5 = vadd.f32 %v425_v0, %v424_v60  ;;  %v1486_v8 = vpack.c.bf16 %v667_v7, %v666_v6  ;;  %v668_v10 = vld [vmem:[%s3262_s1 + $0x30] sm:$0xff]  ;;  %v670_v13 = vld [vmem:[%s3262_s1 + $0x40] sm:$0xff] }
  0x39   :  { %1482 = vmatprep.subr.bf16.mxu0 %v1540_v56  ;;  %v1483_v1 = vpack.c.bf16 %v665_v63, %v664_v62  ;;  %v669_v11 = vld [vmem:[%s3262_s1 + $0x38] sm:$0xff]  ;;  %v671_v14 = vld [vmem:[%s3262_s1 + $0x48] sm:$0xff]  ;;  %v672_v16 = vld [vmem:[%s3262_s1 + $0x50] sm:$0xff]  ;;  %v438_v45 = vand.u32 127, %v437_v42  ;;  %v2159_v46 = vshrl.u32 %v437_v42, 7 }
  0x3a   :  { %369 = vadd.xlane.f32.xlu1 %v368_v27  ;;  %v419_v9 = vadd.f32 %v418_v4, %v417_v3  ;;  %v1489_v12 = vpack.c.bf16 %v669_v11, %v668_v10  ;;  %v1492_v15 = vpack.c.bf16 %v671_v14, %v670_v13  ;;  %v673_v17 = vld [vmem:[%s3262_s1 + $0x58] sm:$0xff]  ;;  %v674_v19 = vld [vmem:[%s3262_s1 + $0x60] sm:$0xff]  ;;  %v675_v20 = vld [vmem:[%s3262_s1 + $0x68] sm:$0xff] }
  0x3b   :  { %v1495_v18 = vpack.c.bf16 %v673_v17, %v672_v16  ;;  %v1498_v21 = vpack.c.bf16 %v675_v20, %v674_v19  ;;  %v676_v22 = vld [vmem:[%s3262_s1 + $0x70] sm:$0xff]  ;;  %v677_v23 = vld [vmem:[%s3262_s1 + $0x78] sm:$0xff]  ;;  %v443_v48 = vadd.s32 4294967288, %v438_v45  ;;  %v485_v49 = vadd.s32 4294967264, %v438_v45 }
  0x3c   :  { %362 = vadd.xlane.f32.xlu0 %v361_v35  ;;  %1484 = vmatpush3.bf16.msra.mxu0 %v1483_v1  ;;  %v1501_v24 = vpack.c.bf16 %v677_v23, %v676_v22  ;;  %v480_v50 = vadd.s32 4294967272, %v438_v45  ;;  %v450_v51 = vadd.s32 4294967280, %v438_v45  ;;  %v526_v53 = vadd.s32 4294967240, %v438_v45 }
  0x3d   :  { %1485 = vmatprep.subr.bf16.mxu0 %v1540_v56  ;;  %v521_v55 = vadd.s32 4294967248, %v438_v45  ;;  %v441_v57 = vsub.s32 %v438_v45, %v2159_v46  ;;  %v567_v58 = vadd.s32 4294967216, %v438_v45  ;;  %v446_v60 = vsub.s32 %v443_v48, %v2159_v46 }
  0x3e   :  { %390 = vadd.xlane.f32.xlu1 %v389_v43  ;;  %v488_v61 = vsub.s32 %v485_v49, %v2159_v46  ;;  %v483_v62 = vsub.s32 %v480_v50, %v2159_v46  ;;  %v2172_v63 = vsub.s32 %v450_v51, %v2159_v46  ;;  %v2178_v1 = vsub.s32 %v526_v53, %v2159_v46 }
  0x3f   :  { %v2183_v3 = vsub.s32 %v521_v55, %v2159_v46  ;;  %v574_v6 = vadd.s32 4294967208, %v438_v45  ;;  %v2189_v7 = vsub.s32 %v567_v58, %v2159_v46  ;;  %v603_v10 = vadd.s32 4294967200, %v438_v45 }
  0x40   :  { %383 = vadd.xlane.f32.xlu0 %v382_v52  ;;  %1487 = vmatpush3.bf16.msra.mxu0 %v1486_v8  ;;  %v492_v52 = vadd.s32 4294967256, %v438_v45  ;;  %v615_v11 = vadd.s32 4294967184, %v438_v45 }
  0x41   :  { %1488 = vmatprep.subr.bf16.mxu0 %v1540_v56  ;;  %v577_v23 = vsub.s32 %v574_v6, %v2159_v46 }
  0x42   :  { %397 = vadd.xlane.f32.xlu1 %v396_v59  ;;  %v2175_v0 = vsub.s32 %v492_v52, %v2159_v46 }
  0x44   :  { %376 = vadd.xlane.f32.xlu0 %v375_v2  ;;  %1490 = vmatpush3.bf16.msra.mxu0 %v1489_v12 }
  0x45   :  { %1491 = vmatprep.subr.bf16.mxu0 %v1540_v56 }
  0x46   :  { %427 = vadd.xlane.f32.xlu1 %v426_v5  ;;  %v562_v5 = vadd.s32 4294967224, %v438_v45 }
  0x48   :  { %420 = vadd.xlane.f32.xlu0 %v419_v9  ;;  %1493 = vmatpush3.bf16.msra.mxu0 %v1492_v15  ;;  %v608_v9 = vadd.s32 4294967192, %v438_v45  ;;  %v640_v15 = vadd.s32 4294967176, %v438_v45  ;;  %v565_v22 = vsub.s32 %v562_v5, %v2159_v46 }
  0x49   :  { %1494 = vmatprep.subr.bf16.mxu0 %v1540_v56 }
  0x4a   :  { %v611_v25 = vsub.s32 %v608_v9, %v2159_v46 }
  0x4c   :  { %1496 = vmatpush3.bf16.msra.mxu0 %v1495_v18 }
  0x4d   :  { %1497 = vmatprep.subr.bf16.mxu0 %v1540_v56 }
  0x50   :  { %1499 = vmatpush3.bf16.msra.mxu0 %v1498_v21 }
  0x51   :  { %1500 = vmatprep.subr.bf16.mxu0 %v1540_v56  ;;  %v533_v56 = vadd.s32 4294967232, %v438_v45 }
  0x53   :  { %v2186_v4 = vsub.s32 %v533_v56, %v2159_v46 }
  0x54   :  { %1502 = vmatpush3.bf16.msra.mxu0 %v1501_v24 }
  0x97   :  { %v2123_v26 = vpop.xlane.xlu1 %71 }
  0x98   :  { %v460_v21 = vrot.slane %v2123_v26, %v441_v57  ;;  %v2210_v26 = vsub.s32 %v640_v15, %v2159_v46 }
  0x99   :  { %v2125_v27 = vpop.xlane.xlu0 %50 }
  0x9a   :  { %v442_v24 = vrot.slane %v2125_v27, %v441_v57 }
  0x9b   :  { %v2127_v28 = vpop.xlane.xlu1 %78 }
  0x9c   :  { %v464_v12 = vrot.slane %v2127_v28, %v446_v60 }
  0x9d   :  { %v2129_v29 = vpop.xlane.xlu0 %57 }
  0x9e   :  { %v447_v13 = vrot.slane %v2129_v29, %v446_v60  ;;  %v606_v29 = vsub.s32 %v603_v10, %v2159_v46 }
  0x9f   :  { %v2131_v30 = vpop.xlane.xlu1 %135 }
  0xa0   :  { %v489_v14 = vrot.slane %v2131_v30, %v488_v61  ;;  %v465_v30 = vsel %vm448_vm2, %v464_v12, %v460_v21 }
  0xa1   :  { %v2133_v31 = vpop.xlane.xlu0 %128 }
  0xa2   :  { %v484_v16 = vrot.slane %v2133_v31, %v483_v62  ;;  %v618_v31 = vsub.s32 %v615_v11, %v2159_v46 }
  0xa3   :  { %v2135_v32 = vpop.xlane.xlu1 %156 }
  0xa4   :  { %v506_v17 = vrot.slane %v2135_v32, %v488_v61  ;;  %v449_v32 = vsel %vm448_vm2, %v447_v13, %v442_v24  ;;  %vm659_vm2 = vcmask 982016  }
  0xa5   :  { %v2137_v33 = vpop.xlane.xlu0 %149 }
  0xa6   :  { %v502_v18 = vrot.slane %v2137_v33, %v483_v62  ;;  %v491_v33 = vsel %vm490_vm3, %v489_v14, %v484_v16 }
  0xa7   :  { %v2139_v34 = vpop.xlane.xlu1 %85 }
  0xa8   :  { %v469_v19 = vrot.slane %v2139_v34, %v2172_v63  ;;  %v507_v27 = vsel %vm490_vm3, %v506_v17, %v502_v18  ;;  %vm750_vm3 = vcmask 64512  }
  0xa9   :  { %v2141_v35 = vpop.xlane.xlu0 %64 }
  0xaa   :  { %v470_v34 = vsel %vm455_vm4, %v469_v19, %v465_v30 }
  0xab   :  { %v2143_v36 = vpop.xlane.xlu1 %163 }
  0xac   :  { %v511_v45 = vrot.slane %v2143_v36, %v2175_v0 }
  0xad   :  { %v2145_v37 = vpop.xlane.xlu0 %142 }
  0xae   :  { %v496_v48 = vrot.slane %v2145_v37, %v2175_v0 }
  0xaf   :  { %v2147_v38 = vpop.xlane.xlu1 %213 }
  0xb0   :  { %v530_v51 = vrot.slane %v2147_v38, %v2178_v1  ;;  %v498_v60 = vsel %vm497_vm5, %v496_v48, %v491_v33 }
  0xb1   :  { %v2149_v39 = vpop.xlane.xlu0 %206 }
  0xb2   :  { %v525_v52 = vrot.slane %v2149_v39, %v2183_v3  ;;  %v454_v39 = vrot.slane %v2141_v35, %v2172_v63 }
  0xb3   :  { %v2151_v40 = vpop.xlane.xlu1 %234 }
  0xb4   :  { %v547_v49 = vrot.slane %v2151_v40, %v2178_v1  ;;  %v532_v61 = vsel %vm531_vm6, %v530_v51, %v525_v52  ;;  %v847_v52 = vsub.s32 1, %v2159_v46 }
  0xb5   :  { %v2153_v41 = vpop.xlane.xlu0 %227 }
  0xb6   :  { %v543_v50 = vrot.slane %v2153_v41, %v2183_v3 }
  0xb7   :  { %v2155_v43 = vpop.xlane.xlu1 %241 }
  0xb8   :  { %v552_v53 = vrot.slane %v2155_v43, %v2186_v4 }
  0xb9   :  { %v2157_v44 = vpop.xlane.xlu0 %220 }
  0xba   :  { %v537_v36 = vrot.slane %v2157_v44, %v2186_v4  ;;  %v512_v44 = vsel %vm497_vm5, %v511_v45, %v507_v27  ;;  %v456_v4 = vsel %vm455_vm4, %v454_v39, %v449_v32 }
  0xbb   :  { %v2161_v47 = vpop.xlane.xlu1 %291  ;;  %v513_v9 = vsel %vm471_vm12, %v512_v44, %v498_v60  ;;  %v472_v15 = vsel %vm471_vm12, %v470_v34, %v456_v4  ;;  %v1515_v44 = vld [vmem:[%s3261_s0] sm:$0xff] }
  0xbc   :  { %v571_v37 = vrot.slane %v2161_v47, %v2189_v7  ;;  %v548_v47 = vsel %vm531_vm6, %v547_v49, %v543_v50  ;;  %v539_v35 = vsel %vm538_vm7, %v537_v36, %v532_v61  ;;  %v652_v19 = vsel %vm651_vm13, %v472_v15, %v513_v9  ;;  %v1517_v61 = vld [vmem:[%s3261_s0 + $0x10] sm:$0xff]  ;;  %v1523_v9 = vld [vmem:[%s3261_s0 + $0x68] sm:$0xff] }
  0xbd   :  { %v2163_v54 = vpop.xlane.xlu0 %284  ;;  %v832_v49 = vsub.s32 0, %v2159_v46  ;;  %v1526_v15 = vld [vmem:[%s3261_s0 + $0x2b0] sm:$0xff] }
  0xbe   :  { %v566_v40 = vrot.slane %v2163_v54, %v565_v22 }
  0xbf   :  { %v2166_v59 = vpop.xlane.xlu1 %312 }
  0xc0   :  { %v588_v41 = vrot.slane %v2166_v59, %v2189_v7  ;;  %v553_v59 = vsel %vm538_vm7, %v552_v53, %v548_v47  ;;  %v573_v63 = vsel %vm572_vm8, %v571_v37, %v566_v40  ;;  %v1511_v40 = vld [vmem:[%s3261_s0 + $0x30] sm:$0xff]  ;;  %v1516_v47 = vld [vmem:[%s3261_s0 + $0x8] sm:$0xff] }
  0xc1   :  { %v2180_v2 = vpop.xlane.xlu0 %305  ;;  %v554_v12 = vsel %vm471_vm12, %v553_v59, %v539_v35 }
  0xc2   :  { %v584_v38 = vrot.slane %v2180_v2, %v565_v22  ;;  %v654_v22 = vsel %vm653_vm14, %v652_v19, %v554_v12  ;;  %v1528_v19 = vld [vmem:[%s3261_s0 + $0x2c0] sm:$0xff] }
  0xc3   :  { %v2191_v8 = vpop.xlane.xlu1 %319 }
  0xc4   :  { %v593_v56 = vrot.slane %v2191_v8, %v577_v23  ;;  %v589_v2 = vsel %vm572_vm8, %v588_v41, %v584_v38  ;;  %v1512_v38 = vld [vmem:[%s3261_s0 + $0x38] sm:$0xff] }
  0xc5   :  { %v299_v20 = vpop.xlane.xlu0 %298 }
  0xc6   :  { %v578_v43 = vrot.slane %v299_v20, %v577_v23  ;;  %v594_v5 = vsel %vm579_vm9, %v593_v56, %v589_v2  ;;  %v1513_v56 = vld [vmem:[%s3261_s0 + $0x40] sm:$0xff] }
  0xc7   :  { %v370_v28 = vpop.xlane.xlu1 %369 }
  0xc8   :  { %v612_v62 = vrot.slane %v370_v28, %v611_v25  ;;  %v580_v6 = vsel %vm579_vm9, %v578_v43, %v573_v63 }
  0xc9   :  { %v363_v42 = vpop.xlane.xlu0 %362  ;;  %v595_v16 = vsel %vm471_vm12, %v594_v5, %v580_v6  ;;  %v1521_v5 = vld [vmem:[%s3261_s0 + $0x58] sm:$0xff] }
  0xca   :  { %v607_v0 = vrot.slane %v363_v42, %v606_v29  ;;  %v656_v24 = vsel %vm655_vm15, %v654_v22, %v595_v16 }
  0xcb   :  { %v391_v55 = vpop.xlane.xlu1 %390 }
  0xcc   :  { %v629_v57 = vrot.slane %v391_v55, %v611_v25  ;;  %v614_v13 = vsel %vm613_vm10, %v612_v62, %v607_v0  ;;  %v1510_v55 = vld [vmem:[%s3261_s0 + $0x28] sm:$0xff]  ;;  %v1518_v62 = vld [vmem:[%s3261_s0 + $0x18] sm:$0xff] }
  0xcd   :  { %v384_v58 = vpop.xlane.xlu0 %383 }
  0xce   :  { %v625_v54 = vrot.slane %v384_v58, %v606_v29 }
  0xcf   :  { %v398_v1 = vpop.xlane.xlu1 %397 }
  0xd0   :  { %v634_v3 = vrot.slane %v398_v1, %v618_v31  ;;  %v630_v7 = vsel %vm613_vm10, %v629_v57, %v625_v54  ;;  %v1514_v57 = vld [vmem:[%s3261_s0 + $0x48] sm:$0xff]  ;;  %v1519_v1 = vld [vmem:[%s3261_s0 + $0x20] sm:$0xff] }
  0xd1   :  { %v377_v8 = vpop.xlane.xlu0 %376 }
  0xd2   :  { %v635_v10 = vsel %vm620_vm11, %v634_v3, %v630_v7  ;;  %v619_v11 = vrot.slane %v377_v8, %v618_v31  ;;  %v749_v31 = vld [vmem:[%s3263_s2] sm:$0xff]  ;;  %v1520_v3 = vld [vmem:[%s3261_s0 + $0x50] sm:$0xff] }
  0xd3   :  { %v428_v14 = vpop.xlane.xlu1 %427  ;;  %1475 = vmatpush3.msra.mxu1 %v749_v31  ;;  %v1522_v7 = vld [vmem:[%s3261_s0 + $0x60] sm:$0xff] }
  0xd4   :  { %v621_v17 = vsel %vm620_vm11, %v619_v11, %v614_v13  ;;  %v648_v18 = vrot.slane %v428_v14, %v2210_v26  ;;  %v1524_v11 = vld [vmem:[%s3261_s0 + $0x70] sm:$0xff]  ;;  %v1525_v13 = vld [vmem:[%s3261_s0 + $0x2a8] sm:$0xff] }
  0xd5   :  { %v636_v20 = vsel %vm471_vm12, %v635_v10, %v621_v17  ;;  %v421_v21 = vpop.xlane.xlu0 %420  ;;  %v1527_v17 = vld [vmem:[%s3261_s0 + $0x2b8] sm:$0xff] }
  0xd6   :  { %v644_v23 = vrot.slane %v421_v21, %v2210_v26  ;;  %v658_v28 = vsel %vm657_vm1, %v656_v24, %v636_v20  ;;  %v1529_v21 = vld [vmem:[%s3261_s0 + $0x2c8] sm:$0xff]  ;;  %v945_v24 = vld [vmem:[%s3261_s0 + $0x80] sm:$0xff] }
  0xd8   :  { %v649_v25 = vsel %vm471_vm12, %v648_v18, %v644_v23  ;;  %v944_v23 = vld [vmem:[%s3261_s0 + $0x78] sm:$0xff] }
  0xd9   :  { %v660_v29 = vsel %vm659_vm2, %v658_v28, %v649_v25  ;;  %v946_v25 = vld [vmem:[%s3261_s0 + $0x88] sm:$0xff] }
  0xda   :  { %v661_v30 = vmul.f32 0.0017361111, %v660_v29  ;;  %v947_v29 = vld [vmem:[%s3261_s0 + $0x90] sm:$0xff] }
  0xdc   :  { %1472 = vmatmul.mubr.f32.vlgmr.msra.gmra.mrb[0].mxu0 %v661_v30  ;;  %v948_v30 = vld [vmem:[%s3261_s0 + $0x98] sm:$0xff] }
 0x1af   :  { %v744_v32 = vpop.f32.mrb[0].mxu0 }
 0x1b0   :  { %v748_v33 = vmax.f32 %v744_v32, 0.0  ;;  %v1473_v27 = vpop.f32.mrb[1].mxu0  ;;  %v1530_v32 = vld [vmem:[%s3261_s0 + $0x280] sm:$0xff] }
 0x1b1   :  { %v1531_v27 = vld [vmem:[%s3261_s0 + $0x288] sm:$0xff] }
 0x1b2   :  { %1477 = vmatmul.mubr.msk.f32.vlgmr.msra.gmra.mrb[0].mxu1 %vm750_vm3, %v748_v33 }
 0x285   :  { %v820_v34 = vpop.f32.mrb[0].mxu1 }
 0x286   :  { %v1419_v26 = vmul.f32 -1.442695, %v820_v34  ;;  %v1478_v42 = vpop.f32.mrb[1].mxu1 }
 0x288   :  { %1506 = vpow2.f32 %v1419_v26  ;;  %v1532_v26 = vld [vmem:[%s3261_s0 + $0x290] sm:$0xff] }
 0x292   :  { %v1507_v45 = vpop.eup %1506 }
 0x293   :  { %v827_v48 = vadd.f32 1.0, %v1507_v45  ;;  %v1533_v45 = vld [vmem:[%s3261_s0 + $0x298] sm:$0xff] }
 0x295   :  { %1508 = vrcp.f32 %v827_v48 }
 0x29f   :  { %v1509_v50 = vpop.eup %1508 }
 0x2a0   :  { %v833_v51 = vrot.slane %v1509_v50, %v832_v49  ;;  %v848_v53 = vrot.slane %v1509_v50, %v847_v52  ;;  %v1534_v49 = vld [vmem:[%s3261_s0 + $0x2a0] sm:$0xff] }
 0x2a2   :  { %839 = vbcast.lane.b32.xlu1 %v833_v51, 264  ;;  %835 = vbcast.lane.b32.xlu0 %v833_v51, 256 }
 0x2a6   :  { %843 = vbcast.lane.b32.xlu1 %v833_v51, 272  ;;  %854 = vbcast.lane.b32.xlu0 %v848_v53, 264 }
 0x2aa   :  { %850 = vbcast.lane.b32.xlu1 %v848_v53, 256  ;;  %922 = vbcast.lane.b32.xlu0 %v833_v51, 280 }
 0x2ae   :  { %858 = vbcast.lane.b32.xlu1 %v848_v53, 272  ;;  %930 = vbcast.lane.b32.xlu0 %v833_v51, 296 }
 0x2b2   :  { %926 = vbcast.lane.b32.xlu1 %v833_v51, 288  ;;  %938 = vbcast.lane.b32.xlu0 %v848_v53, 288 }
 0x2b6   :  { %934 = vbcast.lane.b32.xlu1 %v848_v53, 280  ;;  %1036 = vbcast.lane.b32.xlu0 %v833_v51, 304 }
 0x2ba   :  { %942 = vbcast.lane.b32.xlu1 %v848_v53, 296  ;;  %1044 = vbcast.lane.b32.xlu0 %v833_v51, 320 }
 0x2be   :  { %1040 = vbcast.lane.b32.xlu1 %v833_v51, 312  ;;  %1052 = vbcast.lane.b32.xlu0 %v848_v53, 312 }
 0x2c2   :  { %1048 = vbcast.lane.b32.xlu1 %v848_v53, 304  ;;  %1150 = vbcast.lane.b32.xlu0 %v833_v51, 328 }
 0x2c6   :  { %1056 = vbcast.lane.b32.xlu1 %v848_v53, 320  ;;  %1158 = vbcast.lane.b32.xlu0 %v833_v51, 344 }
 0x2ca   :  { %1154 = vbcast.lane.b32.xlu1 %v833_v51, 336  ;;  %1166 = vbcast.lane.b32.xlu0 %v848_v53, 336 }
 0x2ce   :  { %1162 = vbcast.lane.b32.xlu1 %v848_v53, 328  ;;  %1264 = vbcast.lane.b32.xlu0 %v833_v51, 352 }
 0x2d2   :  { %1170 = vbcast.lane.b32.xlu1 %v848_v53, 344  ;;  %1272 = vbcast.lane.b32.xlu0 %v833_v51, 368 }
 0x2d6   :  { %1268 = vbcast.lane.b32.xlu1 %v833_v51, 360  ;;  %1280 = vbcast.lane.b32.xlu0 %v848_v53, 360 }
 0x2da   :  { %1276 = vbcast.lane.b32.xlu1 %v848_v53, 352  ;;  %1378 = vbcast.lane.b32.xlu0 %v833_v51, 376 }
 0x2de   :  { %1284 = vbcast.lane.b32.xlu1 %v848_v53, 368 }
 0x2e2   :  { %1382 = vbcast.lane.b32.xlu1 %v848_v53, 376 }
 0x314   :  { %v840_v46 = vpop.permute.xlu1 %839  ;;  %v836_v36 = vpop.permute.xlu0 %835 }
 0x315   :  { %v865_v37 = vmul.f32 %v1510_v55, %v840_v46  ;;  %v866_v41 = vmul.f32 %v1511_v40, %v840_v46  ;;  %v867_v39 = vmul.f32 %v1512_v38, %v840_v46  ;;  %v868_v43 = vmul.f32 %v1513_v56, %v840_v46  ;;  %v954_v55 = vld [vmem:[%s3261_s0 + $0xc8] sm:$0xff]  ;;  %v956_v40 = vld [vmem:[%s3261_s0 + $0xd8] sm:$0xff]  ;;  %v957_v38 = vld [vmem:[%s3261_s0 + $0xe0] sm:$0xff] }
 0x316   :  { %v869_v58 = vmul.f32 %v1514_v57, %v840_v46  ;;  %v860_v60 = vmul.f32 %v1515_v44, %v836_v36  ;;  %v861_v54 = vmul.f32 %v1516_v47, %v836_v36  ;;  %v862_v59 = vmul.f32 %v1517_v61, %v836_v36 }
 0x317   :  { %895 = vst [vmem:[%s3264_s3 + $0x28] sm:$0xff] %v865_v37  ;;  %896 = vst [vmem:[%s3264_s3 + $0x30] sm:$0xff] %v866_v41  ;;  %v863_v0 = vmul.f32 %v1518_v62, %v836_v36  ;;  %v864_v35 = vmul.f32 %v1519_v1, %v836_v36  ;;  %v955_v37 = vld [vmem:[%s3261_s0 + $0xd0] sm:$0xff]  ;;  %v950_v62 = vld [vmem:[%s3261_s0 + $0xa8] sm:$0xff] }
 0x318   :  { %897 = vst [vmem:[%s3264_s3 + $0x38] sm:$0xff] %v867_v39  ;;  %898 = vst [vmem:[%s3264_s3 + $0x40] sm:$0xff] %v868_v43  ;;  %v844_v63 = vpop.permute.xlu1 %843  ;;  %v855_v2 = vpop.permute.xlu0 %854  ;;  %v958_v39 = vld [vmem:[%s3261_s0 + $0xe8] sm:$0xff]  ;;  %v1535_v43 = vld [vmem:[%s3261_s0 + $0x2d0] sm:$0xff] }
 0x319   :  { %899 = vst.msk [vmem:[%s3264_s3 + $0x48] sm:$0xff] %vm47_vm0, %v869_v58  ;;  %890 = vst [vmem:[%s3264_s3] sm:$0xff] %v860_v60  ;;  %v870_v4 = vmul.f32 %v1520_v3, %v844_v63  ;;  %v871_v6 = vmul.f32 %v1521_v5, %v844_v63  ;;  %v872_v8 = vmul.f32 %v1522_v7, %v844_v63  ;;  %v1536_v58 = vld [vmem:[%s3261_s0 + $0x2d8] sm:$0xff]  ;;  %v1537_v60 = vld [vmem:[%s3261_s0 + $0x2e0] sm:$0xff] }
 0x31a   :  { %891 = vst [vmem:[%s3264_s3 + $0x8] sm:$0xff] %v861_v54  ;;  %892 = vst [vmem:[%s3264_s3 + $0x10] sm:$0xff] %v862_v59  ;;  %v873_v10 = vmul.f32 %v1523_v9, %v844_v63  ;;  %v874_v12 = vmul.f32 %v1524_v11, %v844_v63  ;;  %v880_v14 = vmul.f32 %v1525_v13, %v855_v2  ;;  %v1538_v54 = vld [vmem:[%s3261_s0 + $0x2e8] sm:$0xff]  ;;  %v949_v59 = vld [vmem:[%s3261_s0 + $0xa0] sm:$0xff] }
 0x31b   :  { %893 = vst [vmem:[%s3264_s3 + $0x18] sm:$0xff] %v863_v0  ;;  %894 = vst.msk [vmem:[%s3264_s3 + $0x20] sm:$0xff] %vm47_vm0, %v864_v35  ;;  %v881_v16 = vmul.f32 %v1526_v15, %v855_v2  ;;  %v882_v18 = vmul.f32 %v1527_v17, %v855_v2  ;;  %v883_v20 = vmul.f32 %v1528_v19, %v855_v2  ;;  %v1539_v0 = vld [vmem:[%s3261_s0 + $0x2f0] sm:$0xff]  ;;  %v953_v5 = vld [vmem:[%s3261_s0 + $0xc0] sm:$0xff] }
 0x31c   :  { %900 = vst [vmem:[%s3264_s3 + $0x50] sm:$0xff] %v870_v4  ;;  %901 = vst [vmem:[%s3264_s3 + $0x58] sm:$0xff] %v871_v6  ;;  %v884_v22 = vmul.f32 %v1529_v21, %v855_v2  ;;  %v851_v28 = vpop.permute.xlu1 %850  ;;  %v923_v31 = vpop.permute.xlu0 %922  ;;  %v951_v3 = vld [vmem:[%s3261_s0 + $0xb0] sm:$0xff]  ;;  %v952_v4 = vld [vmem:[%s3261_s0 + $0xb8] sm:$0xff] }
 0x31d   :  { %902 = vst [vmem:[%s3264_s3 + $0x60] sm:$0xff] %v872_v8  ;;  %903 = vst [vmem:[%s3264_s3 + $0x68] sm:$0xff] %v873_v10  ;;  %v875_v33 = vmul.f32 %v1530_v32, %v851_v28  ;;  %v876_v34 = vmul.f32 %v1531_v27, %v851_v28  ;;  %v877_v42 = vmul.f32 %v1532_v26, %v851_v28  ;;  %v964_v8 = vld [vmem:[%s3261_s0 + $0x320] sm:$0xff]  ;;  %v965_v9 = vld [vmem:[%s3261_s0 + $0x328] sm:$0xff] }
 0x31e   :  { %904 = vst.msk [vmem:[%s3264_s3 + $0x70] sm:$0xff] %vm47_vm0, %v874_v12  ;;  %910 = vst [vmem:[%s3264_s3 + $0x2a8] sm:$0xff] %v880_v14  ;;  %v878_v48 = vmul.f32 %v1533_v45, %v851_v28  ;;  %v879_v50 = vmul.f32 %v1534_v49, %v851_v28  ;;  %v974_v51 = vmul.f32 %v944_v23, %v923_v31  ;;  %v966_v10 = vld [vmem:[%s3261_s0 + $0x330] sm:$0xff]  ;;  %v967_v12 = vld [vmem:[%s3261_s0 + $0x338] sm:$0xff] }
 0x31f   :  { %911 = vst [vmem:[%s3264_s3 + $0x2b0] sm:$0xff] %v881_v16  ;;  %912 = vst [vmem:[%s3264_s3 + $0x2b8] sm:$0xff] %v882_v18  ;;  %v975_v52 = vmul.f32 %v945_v24, %v923_v31  ;;  %v976_v53 = vmul.f32 %v946_v25, %v923_v31  ;;  %v977_v46 = vmul.f32 %v947_v29, %v923_v31  ;;  %v968_v13 = vld [vmem:[%s3261_s0 + $0x340] sm:$0xff]  ;;  %v959_v19 = vld [vmem:[%s3261_s0 + $0x2f8] sm:$0xff] }
 0x320   :  { %913 = vst [vmem:[%s3264_s3 + $0x2c0] sm:$0xff] %v883_v20  ;;  %914 = vst.msk [vmem:[%s3264_s3 + $0x2c8] sm:$0xff] %vm47_vm0, %v884_v22  ;;  %v978_v36 = vmul.f32 %v948_v30, %v923_v31  ;;  %v859_v41 = vpop.permute.xlu1 %858  ;;  %v931_v56 = vpop.permute.xlu0 %930  ;;  %v960_v20 = vld [vmem:[%s3261_s0 + $0x300] sm:$0xff]  ;;  %v961_v25 = vld [vmem:[%s3261_s0 + $0x308] sm:$0xff] }
 0x321   :  { %905 = vst [vmem:[%s3264_s3 + $0x280] sm:$0xff] %v875_v33  ;;  %906 = vst [vmem:[%s3264_s3 + $0x288] sm:$0xff] %v876_v34  ;;  %v885_v57 = vmul.f32 %v1535_v43, %v859_v41  ;;  %v886_v44 = vmul.f32 %v1536_v58, %v859_v41  ;;  %v887_v47 = vmul.f32 %v1537_v60, %v859_v41  ;;  %v962_v28 = vld [vmem:[%s3261_s0 + $0x310] sm:$0xff]  ;;  %v963_v29 = vld [vmem:[%s3261_s0 + $0x318] sm:$0xff] }
 0x322   :  { %907 = vst [vmem:[%s3264_s3 + $0x290] sm:$0xff] %v877_v42  ;;  %908 = vst [vmem:[%s3264_s3 + $0x298] sm:$0xff] %v878_v48  ;;  %v888_v61 = vmul.f32 %v1538_v54, %v859_v41  ;;  %v889_v1 = vmul.f32 %v1539_v0, %v859_v41  ;;  %v984_v35 = vmul.f32 %v954_v55, %v931_v56  ;;  %v1058_v32 = vld [vmem:[%s3261_s0 + $0xf0] sm:$0xff]  ;;  %v1059_v33 = vld [vmem:[%s3261_s0 + $0xf8] sm:$0xff] }
 0x323   :  { %909 = vst.msk [vmem:[%s3264_s3 + $0x2a0] sm:$0xff] %vm47_vm0, %v879_v50  ;;  %1004 = vst [vmem:[%s3264_s3 + $0x78] sm:$0xff] %v974_v51  ;;  %v985_v63 = vmul.f32 %v955_v37, %v931_v56  ;;  %v986_v2 = vmul.f32 %v956_v40, %v931_v56  ;;  %v987_v6 = vmul.f32 %v957_v38, %v931_v56  ;;  %v1060_v27 = vld [vmem:[%s3261_s0 + $0x100] sm:$0xff]  ;;  %v1061_v26 = vld [vmem:[%s3261_s0 + $0x108] sm:$0xff] }
 0x324   :  { %1005 = vst [vmem:[%s3264_s3 + $0x80] sm:$0xff] %v975_v52  ;;  %1006 = vst [vmem:[%s3264_s3 + $0x88] sm:$0xff] %v976_v53  ;;  %v988_v7 = vmul.f32 %v958_v39, %v931_v56  ;;  %v927_v11 = vpop.permute.xlu1 %926  ;;  %v939_v14 = vpop.permute.xlu0 %938  ;;  %v1062_v42 = vld [vmem:[%s3261_s0 + $0x110] sm:$0xff]  ;;  %v969_v52 = vld [vmem:[%s3261_s0 + $0x348] sm:$0xff] }
 0x325   :  { %1007 = vst [vmem:[%s3264_s3 + $0x90] sm:$0xff] %v977_v46  ;;  %1008 = vst.msk [vmem:[%s3264_s3 + $0x98] sm:$0xff] %vm47_vm0, %v978_v36  ;;  %v979_v15 = vmul.f32 %v949_v59, %v927_v11  ;;  %v980_v16 = vmul.f32 %v950_v62, %v927_v11  ;;  %v981_v17 = vmul.f32 %v951_v3, %v927_v11  ;;  %v970_v53 = vld [vmem:[%s3261_s0 + $0x350] sm:$0xff]  ;;  %v971_v40 = vld [vmem:[%s3261_s0 + $0x358] sm:$0xff] }
 0x326   :  { %915 = vst [vmem:[%s3264_s3 + $0x2d0] sm:$0xff] %v885_v57  ;;  %916 = vst [vmem:[%s3264_s3 + $0x2d8] sm:$0xff] %v886_v44  ;;  %v982_v18 = vmul.f32 %v952_v4, %v927_v11  ;;  %v983_v21 = vmul.f32 %v953_v5, %v927_v11  ;;  %v994_v22 = vmul.f32 %v964_v8, %v939_v14  ;;  %v972_v41 = vld [vmem:[%s3261_s0 + $0x360] sm:$0xff]  ;;  %v973_v38 = vld [vmem:[%s3261_s0 + $0x368] sm:$0xff] }
 0x327   :  { %917 = vst [vmem:[%s3264_s3 + $0x2e0] sm:$0xff] %v887_v47  ;;  %918 = vst [vmem:[%s3264_s3 + $0x2e8] sm:$0xff] %v888_v61  ;;  %v995_v23 = vmul.f32 %v965_v9, %v939_v14  ;;  %v996_v24 = vmul.f32 %v966_v10, %v939_v14  ;;  %v997_v30 = vmul.f32 %v967_v12, %v939_v14  ;;  %v1068_v43 = vld [vmem:[%s3261_s0 + $0x140] sm:$0xff]  ;;  %v1069_v57 = vld [vmem:[%s3261_s0 + $0x148] sm:$0xff] }
 0x328   :  { %919 = vst.msk [vmem:[%s3264_s3 + $0x2f0] sm:$0xff] %vm47_vm0, %v889_v1  ;;  %1014 = vst [vmem:[%s3264_s3 + $0xc8] sm:$0xff] %v984_v35  ;;  %v998_v31 = vmul.f32 %v968_v13, %v939_v14  ;;  %v935_v34 = vpop.permute.xlu1 %934  ;;  %v1037_v45 = vpop.permute.xlu0 %1036  ;;  %v1070_v58 = vld [vmem:[%s3261_s0 + $0x150] sm:$0xff]  ;;  %v1071_v60 = vld [vmem:[%s3261_s0 + $0x158] sm:$0xff] }
 0x329   :  { %1015 = vst [vmem:[%s3264_s3 + $0xd0] sm:$0xff] %v985_v63  ;;  %1016 = vst [vmem:[%s3264_s3 + $0xd8] sm:$0xff] %v986_v2  ;;  %v989_v48 = vmul.f32 %v959_v19, %v935_v34  ;;  %v990_v49 = vmul.f32 %v960_v20, %v935_v34  ;;  %v991_v50 = vmul.f32 %v961_v25, %v935_v34  ;;  %v1072_v47 = vld [vmem:[%s3261_s0 + $0x160] sm:$0xff]  ;;  %v1063_v1 = vld [vmem:[%s3261_s0 + $0x118] sm:$0xff] }
 0x32a   :  { %1017 = vst [vmem:[%s3264_s3 + $0xe0] sm:$0xff] %v987_v6  ;;  %1018 = vst.msk [vmem:[%s3264_s3 + $0xe8] sm:$0xff] %vm47_vm0, %v988_v7  ;;  %v992_v51 = vmul.f32 %v962_v28, %v935_v34  ;;  %v993_v46 = vmul.f32 %v963_v29, %v935_v34  ;;  %v1088_v36 = vmul.f32 %v1058_v32, %v1037_v45  ;;  %v1064_v35 = vld [vmem:[%s3261_s0 + $0x120] sm:$0xff]  ;;  %v1065_v5 = vld [vmem:[%s3261_s0 + $0x128] sm:$0xff] }
 0x32b   :  { %1009 = vst [vmem:[%s3264_s3 + $0xa0] sm:$0xff] %v979_v15  ;;  %1010 = vst [vmem:[%s3264_s3 + $0xa8] sm:$0xff] %v980_v16  ;;  %v1089_v55 = vmul.f32 %v1059_v33, %v1037_v45  ;;  %v1090_v37 = vmul.f32 %v1060_v27, %v1037_v45  ;;  %v1091_v39 = vmul.f32 %v1061_v26, %v1037_v45  ;;  %v1066_v6 = vld [vmem:[%s3261_s0 + $0x130] sm:$0xff]  ;;  %v1067_v7 = vld [vmem:[%s3261_s0 + $0x138] sm:$0xff] }
 0x32c   :  { %1011 = vst [vmem:[%s3264_s3 + $0xb0] sm:$0xff] %v981_v17  ;;  %1012 = vst [vmem:[%s3264_s3 + $0xb8] sm:$0xff] %v982_v18  ;;  %v1092_v56 = vmul.f32 %v1062_v42, %v1037_v45  ;;  %v943_v44 = vpop.permute.xlu1 %942  ;;  %v1045_v54 = vpop.permute.xlu0 %1044  ;;  %v1078_v10 = vld [vmem:[%s3261_s0 + $0x398] sm:$0xff]  ;;  %v1079_v11 = vld [vmem:[%s3261_s0 + $0x3a0] sm:$0xff] }
 0x32d   :  { %1013 = vst.msk [vmem:[%s3264_s3 + $0xc0] sm:$0xff] %vm47_vm0, %v983_v21  ;;  %1024 = vst [vmem:[%s3264_s3 + $0x320] sm:$0xff] %v994_v22  ;;  %v999_v61 = vmul.f32 %v969_v52, %v943_v44  ;;  %v1000_v59 = vmul.f32 %v970_v53, %v943_v44  ;;  %v1001_v62 = vmul.f32 %v971_v40, %v943_v44  ;;  %v1080_v12 = vld [vmem:[%s3261_s0 + $0x3a8] sm:$0xff]  ;;  %v1081_v14 = vld [vmem:[%s3261_s0 + $0x3b0] sm:$0xff] }
 0x32e   :  { %1025 = vst [vmem:[%s3264_s3 + $0x328] sm:$0xff] %v995_v23  ;;  %1026 = vst [vmem:[%s3264_s3 + $0x330] sm:$0xff] %v996_v24  ;;  %v1002_v0 = vmul.f32 %v972_v41, %v943_v44  ;;  %v1003_v63 = vmul.f32 %v973_v38, %v943_v44  ;;  %v1098_v2 = vmul.f32 %v1068_v43, %v1045_v54  ;;  %v1082_v15 = vld [vmem:[%s3261_s0 + $0x3b8] sm:$0xff]  ;;  %v1073_v21 = vld [vmem:[%s3261_s0 + $0x370] sm:$0xff] }
 0x32f   :  { %1027 = vst [vmem:[%s3264_s3 + $0x338] sm:$0xff] %v997_v30  ;;  %1028 = vst.msk [vmem:[%s3264_s3 + $0x340] sm:$0xff] %vm47_vm0, %v998_v31  ;;  %v1099_v3 = vmul.f32 %v1069_v57, %v1045_v54  ;;  %v1100_v4 = vmul.f32 %v1070_v58, %v1045_v54  ;;  %v1101_v8 = vmul.f32 %v1071_v60, %v1045_v54  ;;  %v1074_v22 = vld [vmem:[%s3261_s0 + $0x378] sm:$0xff]  ;;  %v1075_v29 = vld [vmem:[%s3261_s0 + $0x380] sm:$0xff] }
 0x330   :  { %1019 = vst [vmem:[%s3264_s3 + $0x2f8] sm:$0xff] %v989_v48  ;;  %1020 = vst [vmem:[%s3264_s3 + $0x300] sm:$0xff] %v990_v49  ;;  %v1102_v9 = vmul.f32 %v1072_v47, %v1045_v54  ;;  %v1041_v13 = vpop.permute.xlu1 %1040  ;;  %v1053_v16 = vpop.permute.xlu0 %1052  ;;  %v1076_v30 = vld [vmem:[%s3261_s0 + $0x388] sm:$0xff]  ;;  %v1077_v31 = vld [vmem:[%s3261_s0 + $0x390] sm:$0xff] }
 0x331   :  { %1021 = vst [vmem:[%s3264_s3 + $0x308] sm:$0xff] %v991_v50  ;;  %1022 = vst [vmem:[%s3264_s3 + $0x310] sm:$0xff] %v992_v51  ;;  %v1093_v17 = vmul.f32 %v1063_v1, %v1041_v13  ;;  %v1094_v18 = vmul.f32 %v1064_v35, %v1041_v13  ;;  %v1095_v19 = vmul.f32 %v1065_v5, %v1041_v13  ;;  %v1172_v27 = vld [vmem:[%s3261_s0 + $0x168] sm:$0xff]  ;;  %v1173_v34 = vld [vmem:[%s3261_s0 + $0x170] sm:$0xff] }
 0x332   :  { %1023 = vst.msk [vmem:[%s3264_s3 + $0x318] sm:$0xff] %vm47_vm0, %v993_v46  ;;  %1118 = vst [vmem:[%s3264_s3 + $0xf0] sm:$0xff] %v1088_v36  ;;  %v1096_v20 = vmul.f32 %v1066_v6, %v1041_v13  ;;  %v1097_v23 = vmul.f32 %v1067_v7, %v1041_v13  ;;  %v1108_v24 = vmul.f32 %v1078_v10, %v1053_v16  ;;  %v1174_v26 = vld [vmem:[%s3261_s0 + $0x178] sm:$0xff]  ;;  %v1175_v45 = vld [vmem:[%s3261_s0 + $0x180] sm:$0xff] }
 0x333   :  { %1119 = vst [vmem:[%s3264_s3 + $0xf8] sm:$0xff] %v1089_v55  ;;  %1120 = vst [vmem:[%s3264_s3 + $0x100] sm:$0xff] %v1090_v37  ;;  %v1109_v25 = vmul.f32 %v1079_v11, %v1053_v16  ;;  %v1110_v28 = vmul.f32 %v1080_v12, %v1053_v16  ;;  %v1111_v32 = vmul.f32 %v1081_v14, %v1053_v16  ;;  %v1176_v48 = vld [vmem:[%s3261_s0 + $0x188] sm:$0xff]  ;;  %v1083_v46 = vld [vmem:[%s3261_s0 + $0x3c0] sm:$0xff] }
 0x334   :  { %1121 = vst [vmem:[%s3264_s3 + $0x108] sm:$0xff] %v1091_v39  ;;  %1122 = vst.msk [vmem:[%s3264_s3 + $0x110] sm:$0xff] %vm47_vm0, %v1092_v56  ;;  %v1112_v33 = vmul.f32 %v1082_v15, %v1053_v16  ;;  %v1049_v42 = vpop.permute.xlu1 %1048  ;;  %v1151_v49 = vpop.permute.xlu0 %1150  ;;  %v1084_v36 = vld [vmem:[%s3261_s0 + $0x3c8] sm:$0xff]  ;;  %v1085_v38 = vld [vmem:[%s3261_s0 + $0x3d0] sm:$0xff] }
 0x335   :  { %1029 = vst [vmem:[%s3264_s3 + $0x348] sm:$0xff] %v999_v61  ;;  %1030 = vst [vmem:[%s3264_s3 + $0x350] sm:$0xff] %v1000_v59  ;;  %v1103_v50 = vmul.f32 %v1073_v21, %v1049_v42  ;;  %v1104_v51 = vmul.f32 %v1074_v22, %v1049_v42  ;;  %v1105_v52 = vmul.f32 %v1075_v29, %v1049_v42  ;;  %v1086_v39 = vld [vmem:[%s3261_s0 + $0x3d8] sm:$0xff]  ;;  %v1087_v56 = vld [vmem:[%s3261_s0 + $0x3e0] sm:$0xff] }
 0x336   :  { %1031 = vst [vmem:[%s3264_s3 + $0x358] sm:$0xff] %v1001_v62  ;;  %1032 = vst [vmem:[%s3264_s3 + $0x360] sm:$0xff] %v1002_v0  ;;  %v1106_v53 = vmul.f32 %v1076_v30, %v1049_v42  ;;  %v1107_v55 = vmul.f32 %v1077_v31, %v1049_v42  ;;  %v1202_v37 = vmul.f32 %v1172_v27, %v1151_v49  ;;  %v1182_v58 = vld [vmem:[%s3261_s0 + $0x1b8] sm:$0xff]  ;;  %v1183_v44 = vld [vmem:[%s3261_s0 + $0x1c0] sm:$0xff] }
 0x337   :  { %1033 = vst.msk [vmem:[%s3264_s3 + $0x368] sm:$0xff] %vm47_vm0, %v1003_v63  ;;  %1128 = vst [vmem:[%s3264_s3 + $0x140] sm:$0xff] %v1098_v2  ;;  %v1203_v40 = vmul.f32 %v1173_v34, %v1151_v49  ;;  %v1204_v41 = vmul.f32 %v1174_v26, %v1151_v49  ;;  %v1205_v43 = vmul.f32 %v1175_v45, %v1151_v49  ;;  %v1184_v60 = vld [vmem:[%s3261_s0 + $0x1c8] sm:$0xff]  ;;  %v1185_v54 = vld [vmem:[%s3261_s0 + $0x1d0] sm:$0xff] }
 0x338   :  { %1129 = vst [vmem:[%s3264_s3 + $0x148] sm:$0xff] %v1099_v3  ;;  %1130 = vst [vmem:[%s3264_s3 + $0x150] sm:$0xff] %v1100_v4  ;;  %v1206_v57 = vmul.f32 %v1176_v48, %v1151_v49  ;;  %v1057_v47 = vpop.permute.xlu1 %1056  ;;  %v1186_v61 = vld [vmem:[%s3261_s0 + $0x1d8] sm:$0xff]  ;;  %v1159_v59 = vpop.permute.xlu0 %1158  ;;  %v1177_v63 = vld [vmem:[%s3261_s0 + $0x190] sm:$0xff] }
 0x339   :  { %1131 = vst [vmem:[%s3264_s3 + $0x158] sm:$0xff] %v1101_v8  ;;  %1132 = vst.msk [vmem:[%s3264_s3 + $0x160] sm:$0xff] %vm47_vm0, %v1102_v9  ;;  %v1113_v62 = vmul.f32 %v1083_v46, %v1057_v47  ;;  %v1114_v0 = vmul.f32 %v1084_v36, %v1057_v47  ;;  %v1115_v1 = vmul.f32 %v1085_v38, %v1057_v47  ;;  %v1178_v2 = vld [vmem:[%s3261_s0 + $0x198] sm:$0xff]  ;;  %v1179_v7 = vld [vmem:[%s3261_s0 + $0x1a0] sm:$0xff] }
 0x33a   :  { %1123 = vst [vmem:[%s3264_s3 + $0x118] sm:$0xff] %v1093_v17  ;;  %1124 = vst [vmem:[%s3264_s3 + $0x120] sm:$0xff] %v1094_v18  ;;  %v1116_v35 = vmul.f32 %v1086_v39, %v1057_v47  ;;  %v1117_v3 = vmul.f32 %v1087_v56, %v1057_v47  ;;  %v1212_v4 = vmul.f32 %v1182_v58, %v1159_v59  ;;  %v1180_v8 = vld [vmem:[%s3261_s0 + $0x1a8] sm:$0xff]  ;;  %v1181_v9 = vld [vmem:[%s3261_s0 + $0x1b0] sm:$0xff] }
 0x33b   :  { %1125 = vst [vmem:[%s3264_s3 + $0x128] sm:$0xff] %v1095_v19  ;;  %1126 = vst [vmem:[%s3264_s3 + $0x130] sm:$0xff] %v1096_v20  ;;  %v1213_v5 = vmul.f32 %v1183_v44, %v1159_v59  ;;  %v1214_v6 = vmul.f32 %v1184_v60, %v1159_v59  ;;  %v1215_v10 = vmul.f32 %v1185_v54, %v1159_v59  ;;  %v1192_v12 = vld [vmem:[%s3261_s0 + $0x410] sm:$0xff]  ;;  %v1193_v13 = vld [vmem:[%s3261_s0 + $0x418] sm:$0xff] }
 0x33c   :  { %1127 = vst.msk [vmem:[%s3264_s3 + $0x138] sm:$0xff] %vm47_vm0, %v1097_v23  ;;  %1138 = vst [vmem:[%s3264_s3 + $0x398] sm:$0xff] %v1108_v24  ;;  %v1216_v11 = vmul.f32 %v1186_v61, %v1159_v59  ;;  %v1194_v14 = vld [vmem:[%s3261_s0 + $0x420] sm:$0xff]  ;;  %v1155_v15 = vpop.permute.xlu1 %1154  ;;  %v1195_v16 = vld [vmem:[%s3261_s0 + $0x428] sm:$0xff]  ;;  %v1167_v18 = vpop.permute.xlu0 %1166 }
 0x33d   :  { %1139 = vst [vmem:[%s3264_s3 + $0x3a0] sm:$0xff] %v1109_v25  ;;  %1140 = vst [vmem:[%s3264_s3 + $0x3a8] sm:$0xff] %v1110_v28  ;;  %v1196_v17 = vld [vmem:[%s3261_s0 + $0x430] sm:$0xff]  ;;  %v1207_v19 = vmul.f32 %v1177_v63, %v1155_v15  ;;  %v1208_v20 = vmul.f32 %v1178_v2, %v1155_v15  ;;  %v1209_v21 = vmul.f32 %v1179_v7, %v1155_v15  ;;  %v1187_v23 = vld [vmem:[%s3261_s0 + $0x3e8] sm:$0xff] }
 0x33e   :  { %1141 = vst [vmem:[%s3264_s3 + $0x3b0] sm:$0xff] %v1111_v32  ;;  %1142 = vst.msk [vmem:[%s3264_s3 + $0x3b8] sm:$0xff] %vm47_vm0, %v1112_v33  ;;  %v1210_v22 = vmul.f32 %v1180_v8, %v1155_v15  ;;  %v1188_v24 = vld [vmem:[%s3261_s0 + $0x3f0] sm:$0xff]  ;;  %v1211_v25 = vmul.f32 %v1181_v9, %v1155_v15  ;;  %v1222_v28 = vmul.f32 %v1192_v12, %v1167_v18  ;;  %v1189_v31 = vld [vmem:[%s3261_s0 + $0x3f8] sm:$0xff] }
 0x33f   :  { %1133 = vst [vmem:[%s3264_s3 + $0x370] sm:$0xff] %v1103_v50  ;;  %1134 = vst [vmem:[%s3264_s3 + $0x378] sm:$0xff] %v1104_v51  ;;  %v1223_v29 = vmul.f32 %v1193_v13, %v1167_v18  ;;  %v1224_v30 = vmul.f32 %v1194_v14, %v1167_v18  ;;  %v1190_v32 = vld [vmem:[%s3261_s0 + $0x400] sm:$0xff]  ;;  %v1191_v33 = vld [vmem:[%s3261_s0 + $0x408] sm:$0xff]  ;;  %v1225_v27 = vmul.f32 %v1195_v16, %v1167_v18 }
 0x340   :  { %1135 = vst [vmem:[%s3264_s3 + $0x380] sm:$0xff] %v1105_v52  ;;  %1136 = vst [vmem:[%s3264_s3 + $0x388] sm:$0xff] %v1106_v53  ;;  %v1226_v34 = vmul.f32 %v1196_v17, %v1167_v18  ;;  %v1286_v26 = vld [vmem:[%s3261_s0 + $0x1e0] sm:$0xff]  ;;  %v1287_v42 = vld [vmem:[%s3261_s0 + $0x1e8] sm:$0xff]  ;;  %v1163_v48 = vpop.permute.xlu1 %1162  ;;  %v1265_v51 = vpop.permute.xlu0 %1264 }
 0x341   :  { %1137 = vst.msk [vmem:[%s3264_s3 + $0x390] sm:$0xff] %vm47_vm0, %v1107_v55  ;;  %1232 = vst [vmem:[%s3264_s3 + $0x168] sm:$0xff] %v1202_v37  ;;  %v1288_v45 = vld [vmem:[%s3261_s0 + $0x1f0] sm:$0xff]  ;;  %v1289_v49 = vld [vmem:[%s3261_s0 + $0x1f8] sm:$0xff]  ;;  %v1217_v52 = vmul.f32 %v1187_v23, %v1163_v48  ;;  %v1218_v53 = vmul.f32 %v1188_v24, %v1163_v48  ;;  %v1219_v46 = vmul.f32 %v1189_v31, %v1163_v48 }
 0x342   :  { %1233 = vst [vmem:[%s3264_s3 + $0x170] sm:$0xff] %v1203_v40  ;;  %1234 = vst [vmem:[%s3264_s3 + $0x178] sm:$0xff] %v1204_v41  ;;  %v1290_v50 = vld [vmem:[%s3261_s0 + $0x200] sm:$0xff]  ;;  %v1220_v36 = vmul.f32 %v1190_v32, %v1163_v48  ;;  %v1197_v55 = vld [vmem:[%s3261_s0 + $0x438] sm:$0xff]  ;;  %v1221_v40 = vmul.f32 %v1191_v33, %v1163_v48  ;;  %v1316_v41 = vmul.f32 %v1286_v26, %v1265_v51 }
 0x343   :  { %1235 = vst [vmem:[%s3264_s3 + $0x180] sm:$0xff] %v1205_v43  ;;  %1236 = vst.msk [vmem:[%s3264_s3 + $0x188] sm:$0xff] %vm47_vm0, %v1206_v57  ;;  %v1198_v37 = vld [vmem:[%s3261_s0 + $0x440] sm:$0xff]  ;;  %v1317_v38 = vmul.f32 %v1287_v42, %v1265_v51  ;;  %v1318_v39 = vmul.f32 %v1288_v45, %v1265_v51  ;;  %v1199_v56 = vld [vmem:[%s3261_s0 + $0x448] sm:$0xff]  ;;  %v1319_v58 = vmul.f32 %v1289_v49, %v1265_v51 }
 0x344   :  { %1143 = vst [vmem:[%s3264_s3 + $0x3c0] sm:$0xff] %v1113_v62  ;;  %1144 = vst [vmem:[%s3264_s3 + $0x3c8] sm:$0xff] %v1114_v0  ;;  %v1200_v43 = vld [vmem:[%s3261_s0 + $0x450] sm:$0xff]  ;;  %v1201_v57 = vld [vmem:[%s3261_s0 + $0x458] sm:$0xff]  ;;  %v1320_v44 = vmul.f32 %v1290_v50, %v1265_v51  ;;  %v1171_v61 = vpop.permute.xlu1 %1170  ;;  %v1273_v0 = vpop.permute.xlu0 %1272 }
 0x345   :  { %1145 = vst [vmem:[%s3264_s3 + $0x3d0] sm:$0xff] %v1115_v1  ;;  %1146 = vst [vmem:[%s3264_s3 + $0x3d8] sm:$0xff] %v1116_v35  ;;  %v1296_v60 = vld [vmem:[%s3261_s0 + $0x230] sm:$0xff]  ;;  %v1297_v47 = vld [vmem:[%s3261_s0 + $0x238] sm:$0xff]  ;;  %v1227_v1 = vmul.f32 %v1197_v55, %v1171_v61  ;;  %v1228_v35 = vmul.f32 %v1198_v37, %v1171_v61  ;;  %v1229_v63 = vmul.f32 %v1199_v56, %v1171_v61 }
 0x346   :  { %1147 = vst.msk [vmem:[%s3264_s3 + $0x3e0] sm:$0xff] %vm47_vm0, %v1117_v3  ;;  %1242 = vst [vmem:[%s3264_s3 + $0x1b8] sm:$0xff] %v1212_v4  ;;  %v1298_v54 = vld [vmem:[%s3261_s0 + $0x240] sm:$0xff]  ;;  %v1299_v59 = vld [vmem:[%s3261_s0 + $0x248] sm:$0xff]  ;;  %v1230_v2 = vmul.f32 %v1200_v43, %v1171_v61  ;;  %v1327_v7 = vmul.f32 %v1297_v47, %v1273_v0 }
 0x347   :  { %1243 = vst [vmem:[%s3264_s3 + $0x1c0] sm:$0xff] %v1213_v5  ;;  %1244 = vst [vmem:[%s3264_s3 + $0x1c8] sm:$0xff] %v1214_v6  ;;  %v1300_v62 = vld [vmem:[%s3261_s0 + $0x250] sm:$0xff]  ;;  %v1291_v3 = vld [vmem:[%s3261_s0 + $0x208] sm:$0xff]  ;;  %v1231_v5 = vmul.f32 %v1201_v57, %v1171_v61  ;;  %v1326_v6 = vmul.f32 %v1296_v60, %v1273_v0  ;;  %v1328_v8 = vmul.f32 %v1298_v54, %v1273_v0 }
 0x348   :  { %1245 = vst [vmem:[%s3264_s3 + $0x1d0] sm:$0xff] %v1215_v10  ;;  %1246 = vst.msk [vmem:[%s3264_s3 + $0x1d8] sm:$0xff] %vm47_vm0, %v1216_v11  ;;  %v1292_v4 = vld [vmem:[%s3261_s0 + $0x210] sm:$0xff]  ;;  %v1293_v9 = vld [vmem:[%s3261_s0 + $0x218] sm:$0xff]  ;;  %v1329_v12 = vmul.f32 %v1299_v59, %v1273_v0  ;;  %v1330_v13 = vmul.f32 %v1300_v62, %v1273_v0  ;;  %v1269_v17 = vpop.permute.xlu1 %1268 }
 0x349   :  { %1237 = vst [vmem:[%s3264_s3 + $0x190] sm:$0xff] %v1207_v19  ;;  %1238 = vst [vmem:[%s3264_s3 + $0x198] sm:$0xff] %v1208_v20  ;;  %v1294_v10 = vld [vmem:[%s3261_s0 + $0x220] sm:$0xff]  ;;  %v1295_v11 = vld [vmem:[%s3261_s0 + $0x228] sm:$0xff]  ;;  %v1281_v20 = vpop.permute.xlu0 %1280  ;;  %v1323_v23 = vmul.f32 %v1293_v9, %v1269_v17 }
 0x34a   :  { %1239 = vst [vmem:[%s3264_s3 + $0x1a0] sm:$0xff] %v1209_v21  ;;  %1240 = vst [vmem:[%s3264_s3 + $0x1a8] sm:$0xff] %v1210_v22  ;;  %v1306_v14 = vld [vmem:[%s3261_s0 + $0x488] sm:$0xff]  ;;  %v1307_v15 = vld [vmem:[%s3261_s0 + $0x490] sm:$0xff]  ;;  %v1321_v21 = vmul.f32 %v1291_v3, %v1269_v17  ;;  %v1322_v22 = vmul.f32 %v1292_v4, %v1269_v17  ;;  %v1324_v24 = vmul.f32 %v1294_v10, %v1269_v17 }
 0x34b   :  { %1241 = vst.msk [vmem:[%s3264_s3 + $0x1b0] sm:$0xff] %vm47_vm0, %v1211_v25  ;;  %1252 = vst [vmem:[%s3264_s3 + $0x410] sm:$0xff] %v1222_v28  ;;  %v1308_v16 = vld [vmem:[%s3261_s0 + $0x498] sm:$0xff]  ;;  %v1309_v18 = vld [vmem:[%s3261_s0 + $0x4a0] sm:$0xff]  ;;  %v1337_v31 = vmul.f32 %v1307_v15, %v1281_v20 }
 0x34c   :  { %1253 = vst [vmem:[%s3264_s3 + $0x418] sm:$0xff] %v1223_v29  ;;  %1254 = vst [vmem:[%s3264_s3 + $0x420] sm:$0xff] %v1224_v30  ;;  %v1310_v19 = vld [vmem:[%s3261_s0 + $0x4a8] sm:$0xff]  ;;  %v1301_v25 = vld [vmem:[%s3261_s0 + $0x460] sm:$0xff]  ;;  %v1325_v29 = vmul.f32 %v1295_v11, %v1269_v17  ;;  %v1336_v30 = vmul.f32 %v1306_v14, %v1281_v20  ;;  %v1338_v32 = vmul.f32 %v1308_v16, %v1281_v20  ;;  %v1277_v50 = vpop.permute.xlu1 %1276 }
 0x34d   :  { %1255 = vst [vmem:[%s3264_s3 + $0x428] sm:$0xff] %v1225_v27  ;;  %1256 = vst.msk [vmem:[%s3264_s3 + $0x430] sm:$0xff] %vm47_vm0, %v1226_v34  ;;  %v1302_v28 = vld [vmem:[%s3261_s0 + $0x468] sm:$0xff]  ;;  %v1303_v33 = vld [vmem:[%s3261_s0 + $0x470] sm:$0xff]  ;;  %v1339_v26 = vmul.f32 %v1309_v18, %v1281_v20  ;;  %v1340_v42 = vmul.f32 %v1310_v19, %v1281_v20 }
 0x34e   :  { %1247 = vst [vmem:[%s3264_s3 + $0x3e8] sm:$0xff] %v1217_v52  ;;  %1248 = vst [vmem:[%s3264_s3 + $0x3f0] sm:$0xff] %v1218_v53  ;;  %v1304_v27 = vld [vmem:[%s3261_s0 + $0x478] sm:$0xff]  ;;  %v1305_v34 = vld [vmem:[%s3261_s0 + $0x480] sm:$0xff]  ;;  %v1379_v53 = vpop.permute.xlu0 %1378  ;;  %v1333_v55 = vmul.f32 %v1303_v33, %v1277_v50 }
 0x34f   :  { %1249 = vst [vmem:[%s3264_s3 + $0x3f8] sm:$0xff] %v1219_v46  ;;  %1250 = vst [vmem:[%s3264_s3 + $0x400] sm:$0xff] %v1220_v36  ;;  %v1384_v45 = vld [vmem:[%s3261_s0 + $0x258] sm:$0xff]  ;;  %v1385_v48 = vld [vmem:[%s3261_s0 + $0x260] sm:$0xff]  ;;  %v1331_v46 = vmul.f32 %v1301_v25, %v1277_v50  ;;  %v1332_v36 = vmul.f32 %v1302_v28, %v1277_v50  ;;  %v1334_v37 = vmul.f32 %v1304_v27, %v1277_v50 }
 0x350   :  { %1251 = vst.msk [vmem:[%s3264_s3 + $0x408] sm:$0xff] %vm47_vm0, %v1221_v40  ;;  %1346 = vst [vmem:[%s3264_s3 + $0x1e0] sm:$0xff] %v1316_v41  ;;  %v1386_v49 = vld [vmem:[%s3261_s0 + $0x268] sm:$0xff]  ;;  %v1387_v51 = vld [vmem:[%s3261_s0 + $0x270] sm:$0xff]  ;;  %v1335_v41 = vmul.f32 %v1305_v34, %v1277_v50  ;;  %v1285_v54 = vpop.permute.xlu1 %1284 }
 0x351   :  { %1347 = vst [vmem:[%s3264_s3 + $0x1e8] sm:$0xff] %v1317_v38  ;;  %1348 = vst [vmem:[%s3264_s3 + $0x1f0] sm:$0xff] %v1318_v39  ;;  %v1388_v52 = vld [vmem:[%s3261_s0 + $0x278] sm:$0xff]  ;;  %v1311_v40 = vld [vmem:[%s3261_s0 + $0x4b0] sm:$0xff]  ;;  %v1394_v38 = vmul.f32 %v1384_v45, %v1379_v53  ;;  %v1395_v39 = vmul.f32 %v1385_v48, %v1379_v53  ;;  %v1396_v56 = vmul.f32 %v1386_v49, %v1379_v53 }
 0x352   :  { %1349 = vst [vmem:[%s3264_s3 + $0x1f8] sm:$0xff] %v1319_v58  ;;  %1350 = vst.msk [vmem:[%s3264_s3 + $0x200] sm:$0xff] %vm47_vm0, %v1320_v44  ;;  %v1312_v43 = vld [vmem:[%s3261_s0 + $0x4b8] sm:$0xff]  ;;  %v1313_v57 = vld [vmem:[%s3261_s0 + $0x4c0] sm:$0xff]  ;;  %v1397_v44 = vmul.f32 %v1387_v51, %v1379_v53  ;;  %v1398_v60 = vmul.f32 %v1388_v52, %v1379_v53  ;;  %v1341_v61 = vmul.f32 %v1311_v40, %v1285_v54 }
 0x353   :  { %1257 = vst [vmem:[%s3264_s3 + $0x438] sm:$0xff] %v1227_v1  ;;  %1258 = vst [vmem:[%s3264_s3 + $0x440] sm:$0xff] %v1228_v35  ;;  %v1314_v58 = vld [vmem:[%s3261_s0 + $0x4c8] sm:$0xff]  ;;  %v1315_v47 = vld [vmem:[%s3261_s0 + $0x4d0] sm:$0xff]  ;;  %v1342_v59 = vmul.f32 %v1312_v43, %v1285_v54  ;;  %v1343_v62 = vmul.f32 %v1313_v57, %v1285_v54 }
 0x354   :  { %1259 = vst [vmem:[%s3264_s3 + $0x448] sm:$0xff] %v1229_v63  ;;  %1260 = vst [vmem:[%s3264_s3 + $0x450] sm:$0xff] %v1230_v2  ;;  %v1344_v0 = vmul.f32 %v1314_v58, %v1285_v54  ;;  %v1389_v1 = vld [vmem:[%s3261_s0 + $0x4d8] sm:$0xff]  ;;  %v1345_v35 = vmul.f32 %v1315_v47, %v1285_v54  ;;  %v1390_v63 = vld [vmem:[%s3261_s0 + $0x4e0] sm:$0xff] }
 0x355   :  { %1261 = vst.msk [vmem:[%s3264_s3 + $0x458] sm:$0xff] %vm47_vm0, %v1231_v5  ;;  %1356 = vst [vmem:[%s3264_s3 + $0x230] sm:$0xff] %v1326_v6  ;;  %v1391_v2 = vld [vmem:[%s3261_s0 + $0x4e8] sm:$0xff]  ;;  %v1392_v3 = vld [vmem:[%s3261_s0 + $0x4f0] sm:$0xff]  ;;  %v1383_v5 = vpop.permute.xlu1 %1382 }
 0x356   :  { %1357 = vst [vmem:[%s3264_s3 + $0x238] sm:$0xff] %v1327_v7  ;;  %1358 = vst [vmem:[%s3264_s3 + $0x240] sm:$0xff] %v1328_v8  ;;  %v1393_v4 = vld [vmem:[%s3261_s0 + $0x4f8] sm:$0xff]  ;;  %v1399_v6 = vmul.f32 %v1389_v1, %v1383_v5  ;;  %v1400_v7 = vmul.f32 %v1390_v63, %v1383_v5  ;;  %v1401_v8 = vmul.f32 %v1391_v2, %v1383_v5 }
 0x357   :  { %1359 = vst [vmem:[%s3264_s3 + $0x248] sm:$0xff] %v1329_v12  ;;  %1360 = vst.msk [vmem:[%s3264_s3 + $0x250] sm:$0xff] %vm47_vm0, %v1330_v13  ;;  %v1402_v9 = vmul.f32 %v1392_v3, %v1383_v5  ;;  %v1403_v10 = vmul.f32 %v1393_v4, %v1383_v5 }
 0x358   :  { %1351 = vst [vmem:[%s3264_s3 + $0x208] sm:$0xff] %v1321_v21  ;;  %1352 = vst [vmem:[%s3264_s3 + $0x210] sm:$0xff] %v1322_v22 }
 0x359   :  { %1353 = vst [vmem:[%s3264_s3 + $0x218] sm:$0xff] %v1323_v23  ;;  %1354 = vst [vmem:[%s3264_s3 + $0x220] sm:$0xff] %v1324_v24 }
 0x35a   :  { %1355 = vst.msk [vmem:[%s3264_s3 + $0x228] sm:$0xff] %vm47_vm0, %v1325_v29  ;;  %1366 = vst [vmem:[%s3264_s3 + $0x488] sm:$0xff] %v1336_v30 }
 0x35b   :  { %1367 = vst [vmem:[%s3264_s3 + $0x490] sm:$0xff] %v1337_v31  ;;  %1368 = vst [vmem:[%s3264_s3 + $0x498] sm:$0xff] %v1338_v32 }
 0x35c   :  { %1369 = vst [vmem:[%s3264_s3 + $0x4a0] sm:$0xff] %v1339_v26  ;;  %1370 = vst.msk [vmem:[%s3264_s3 + $0x4a8] sm:$0xff] %vm47_vm0, %v1340_v42 }
 0x35d   :  { %1361 = vst [vmem:[%s3264_s3 + $0x460] sm:$0xff] %v1331_v46  ;;  %1362 = vst [vmem:[%s3264_s3 + $0x468] sm:$0xff] %v1332_v36 }
 0x35e   :  { %1363 = vst [vmem:[%s3264_s3 + $0x470] sm:$0xff] %v1333_v55  ;;  %1364 = vst [vmem:[%s3264_s3 + $0x478] sm:$0xff] %v1334_v37 }
 0x35f   :  { %1365 = vst.msk [vmem:[%s3264_s3 + $0x480] sm:$0xff] %vm47_vm0, %v1335_v41  ;;  %1404 = vst [vmem:[%s3264_s3 + $0x258] sm:$0xff] %v1394_v38 }
 0x360   :  { %1405 = vst [vmem:[%s3264_s3 + $0x260] sm:$0xff] %v1395_v39  ;;  %1406 = vst [vmem:[%s3264_s3 + $0x268] sm:$0xff] %v1396_v56 }
 0x361   :  { %1407 = vst [vmem:[%s3264_s3 + $0x270] sm:$0xff] %v1397_v44  ;;  %1408 = vst.msk [vmem:[%s3264_s3 + $0x278] sm:$0xff] %vm47_vm0, %v1398_v60 }
 0x362   :  { %1371 = vst [vmem:[%s3264_s3 + $0x4b0] sm:$0xff] %v1341_v61  ;;  %1372 = vst [vmem:[%s3264_s3 + $0x4b8] sm:$0xff] %v1342_v59 }
 0x363   :  { %1373 = vst [vmem:[%s3264_s3 + $0x4c0] sm:$0xff] %v1343_v62  ;;  %1374 = vst [vmem:[%s3264_s3 + $0x4c8] sm:$0xff] %v1344_v0 }
 0x364   :  { %1375 = vst.msk [vmem:[%s3264_s3 + $0x4d0] sm:$0xff] %vm47_vm0, %v1345_v35  ;;  %1409 = vst [vmem:[%s3264_s3 + $0x4d8] sm:$0xff] %v1399_v6 }
 0x365   :  { %1410 = vst [vmem:[%s3264_s3 + $0x4e0] sm:$0xff] %v1400_v7  ;;  %1411 = vst [vmem:[%s3264_s3 + $0x4e8] sm:$0xff] %v1401_v8 }
 0x366   :  { %1412 = vst [vmem:[%s3264_s3 + $0x4f0] sm:$0xff] %v1402_v9  ;;  %1413 = vst.msk [vmem:[%s3264_s3 + $0x4f8] sm:$0xff] %vm47_vm0, %v1403_v10 }

</bundles_post_ra>
